<compile_context>
chip_gen: v7x
topology: tpu7x:2x2x1
jax: 0.10.0
libtpu: 0.0.40
codegen_flags: <defaults>
</compile_context>

<pallas_src>
import jax
import jax.numpy as jnp
from jax import lax
from jax.experimental import pallas as pl
from jax.experimental.pallas import tpu as pltpu

NLAYER = 4
C_IN, C_HID, C_OUT = 20, 32, 3
BN_EPS = 1e-5


# ------------------------------- kernel ------------------------------------

def _make_kernel(L):
    """Kernel closure over the per-sample sequence length L (static)."""

    def kernel(x_ref, w1_ref, b1_ref, wc_ref, bc_ref, wo_ref, bo_ref, o_ref):
        BL = x_ref.shape[-1]                      # = B_blk * L (lane dim)

        # Per-sample boundary masks (batch is concatenated along lanes, so a
        # plain roll would leak across sample boundaries).  Hoisted once per
        # grid step and reused by all 5 convs.
        pos = lax.broadcasted_iota(jnp.int32, (C_HID, BL), 1) % L
        not_first = pos != 0                      # left zero-pad position
        not_last = pos != (L - 1)                 # right zero-pad position

        def conv3(h, w_cat, b):
            # 'same' 3-tap conv1d as ONE MXU matmul over K = 3*C_HID = 96:
            # stacked[:, l] = [h[:, l-1]; h[:, l]; h[:, l+1]] (zeros at sample
            # edges), weights pre-concatenated on the host as (Cout, 3*Cin).
            h_m1 = jnp.where(not_first, pltpu.roll(h, 1, axis=1), 0.0)
            h_p1 = jnp.where(not_last, pltpu.roll(h, BL - 1, axis=1), 0.0)
            stacked = jnp.concatenate([h_m1, h, h_p1], axis=0)        # (96, BL)
            return jnp.dot(w_cat, stacked,
                           preferred_element_type=jnp.float32) + b

        # Dropout(p=0.1) is identity in inference mode.
        h = conv3(x_ref[...], w1_ref[...], b1_ref[...])               # (32, BL)
        for k in range(NLAYER):                                       # unrolled
            # Conv1d(32,32,3,pad=1) with eval-BN folded in, then ReLU.
            h = jnp.maximum(conv3(h, wc_ref[k], bc_ref[k]), 0.0)
        # Linear(32,3) over channels == (3,32) @ (32,BL); lane-dense store.
        o_ref[...] = (jnp.dot(wo_ref[...], h,
                              preferred_element_type=jnp.float32) + bo_ref[...])

    return kernel


def cnn2_forward(x, kparams, block_batch=None):
    """x: (N, 20, L) float32 -> (N, 3, L) float32."""
    w1_cat, b1, wc, bc, wo, bo = kparams
    N, cin, L = x.shape
    assert cin == C_IN and L % 128 == 0

    if block_batch is None:
        # Largest divisor of N capped at 32, preferring a grid of >= 2 steps
        # so both v7x TensorCores get work via the "parallel" grid axis.
        cap = min(32, max(1, N // 2)) if N > 1 else 1
        block_batch = 1
        for cand in range(cap, 0, -1):
            if N % cand == 0:
                block_batch = cand
                break
    assert N % block_batch == 0
    grid = (N // block_batch,)
    BL = block_batch * L

    # Channel-major with batch merged into lanes: (C_HID, N*L).
    # Zero-pad input channels 20 -> 32 (matching weight columns are zero).
    xp = jnp.pad(x, ((0, 0), (0, C_HID - C_IN), (0, 0)))
    x2 = jnp.transpose(xp, (1, 0, 2)).reshape(C_HID, N * L)

    def full(a):
        return pl.BlockSpec(a.shape, lambda n, _nd=a.ndim: (0,) * _nd)

    out = pl.pallas_call(
        _make_kernel(L),
        out_shape=jax.ShapeDtypeStruct((C_OUT, N * L), jnp.float32),
        grid_spec=pltpu.PrefetchScalarGridSpec(
            num_scalar_prefetch=0,
            grid=grid,
            in_specs=[
                pl.BlockSpec((C_HID, BL), lambda n: (0, n)),   # x batch block
                full(w1_cat), full(b1),                        # conv1 (folded taps)
                full(wc), full(bc),                            # 4 hidden convs (BN folded)
                full(wo), full(bo),                            # out linear
            ],
            out_specs=pl.BlockSpec((C_OUT, BL), lambda n: (0, n)),
        ),
        compiler_params=pltpu.CompilerParams(dimension_semantics=("parallel",)),
    )(x2, w1_cat, b1, wc, bc, wo, bo)

    return jnp.transpose(out.reshape(C_OUT, N, L), (1, 0, 2))


# ----------------------------- parameter setup -----------------------------

def init_raw_params(key):
    """PyTorch-style init (uniform(-1/sqrt(fan_in), +)); non-trivial BN stats."""
    ks = iter(jax.random.split(key, 32))

    def u(shape, fan_in):
        bound = 1.0 / jnp.sqrt(float(fan_in))
        return jax.random.uniform(next(ks), shape, jnp.float32, -bound, bound)

    w1 = u((C_HID, C_IN, 3), C_IN * 3)
    b1 = u((C_HID,), C_IN * 3)
    wcs, bcs, gammas, betas, means, varis = [], [], [], [], [], []
    for _ in range(NLAYER):
        wcs.append(u((C_HID, C_HID, 3), C_HID * 3))
        bcs.append(u((C_HID,), C_HID * 3))
        gammas.append(jax.random.uniform(next(ks), (C_HID,), jnp.float32, 0.5, 1.5))
        betas.append(0.1 * jax.random.normal(next(ks), (C_HID,), jnp.float32))
        means.append(0.1 * jax.random.normal(next(ks), (C_HID,), jnp.float32))
        varis.append(jax.random.uniform(next(ks), (C_HID,), jnp.float32, 0.5, 1.5))
    wo = u((C_OUT, C_HID), C_HID)
    bo = u((C_OUT,), C_HID)
    return (w1, b1, wcs, bcs, gammas, betas, means, varis, wo, bo)


def pack_kernel_params(raw):
    """Fold BN into conv weights/biases; concatenate the 3 taps along K."""
    w1, b1, wcs, bcs, gammas, betas, means, varis, wo, bo = raw

    # conv1: pad input channels 20 -> 32 with zero weights, concat taps -> (32, 96)
    w1p = jnp.pad(w1, ((0, 0), (0, C_HID - C_IN), (0, 0)))
    w1_cat = jnp.concatenate([w1p[:, :, 0], w1p[:, :, 1], w1p[:, :, 2]], axis=1)
    b1_c = b1[:, None]

    wc_list, bc_list = [], []
    for k in range(NLAYER):
        s = gammas[k] / jnp.sqrt(varis[k] + BN_EPS)            # per-channel scale
        wf = wcs[k] * s[:, None, None]                         # fold BN into weights
        bf = s * (bcs[k] - means[k]) + betas[k]                # fold BN into bias
        wc_list.append(jnp.concatenate([wf[:, :, 0], wf[:, :, 1], wf[:, :, 2]],
                                       axis=1))                # (32, 96)
        bc_list.append(bf[:, None])
    wc = jnp.stack(wc_list)                                    # (4, 32, 96)
    bc = jnp.stack(bc_list)                                    # (4, 32, 1)
    return (w1_cat, b1_c, wc, bc, wo, bo[:, None])


def reference_forward(x, raw):
    """Pure-JAX (XLA) reference of the PyTorch forward (eval mode)."""
    w1, b1, wcs, bcs, gammas, betas, means, varis, wo, bo = raw
    dn = lax.conv_dimension_numbers(x.shape, w1.shape, ("NCH", "OIH", "NCH"))

    def conv(h, w, b):
        y = lax.conv_general_dilated(h, w, (1,), ((1, 1),), dimension_numbers=dn)
        return y + b[None, :, None]

    h = conv(x, w1, b1)  # dropout is identity in eval
    for k in range(NLAYER):
        h = conv(h, wcs[k], bcs[k])
        h = ((h - means[k][None, :, None])
             / jnp.sqrt(varis[k][None, :, None] + BN_EPS)
             * gammas[k][None, :, None] + betas[k][None, :, None])
        h = jnp.maximum(h, 0.0)
    return jnp.einsum("ncl,oc->nol", h, wo) + bo[None, :, None]


if __name__ == "__main__":
    key = jax.random.PRNGKey(0)
    kp, kx = jax.random.split(key)

    N, L = 8, 128                      # small batch, lane-aligned sequence length
    x = jax.random.normal(kx, (N, C_IN, L), jnp.float32)

    raw = init_raw_params(kp)
    kparams = pack_kernel_params(raw)

    out = cnn2_forward(x, kparams)     # block_batch auto -> 4 samples/step, grid=2
    out = jax.block_until_ready(out)

    ref = reference_forward(x, raw)
    assert out.shape == (N, C_OUT, L)
    assert jnp.allclose(out, ref, rtol=1e-4, atol=1e-4), "mismatch vs XLA reference"

    print("KERNEL_OK")
</pallas_src>

<mosaic_0001>
module attributes {stable_mosaic.version = 11 : i64} {
  func.func @kernel(%arg0: i32, %arg1: memref<32x512xf32, #tpu.memory_space<vmem>>, %arg2: memref<32x96xf32, #tpu.memory_space<vmem>>, %arg3: memref<32x1xf32, #tpu.memory_space<vmem>>, %arg4: memref<4x32x96xf32, #tpu.memory_space<vmem>>, %arg5: memref<4x32x1xf32, #tpu.memory_space<vmem>>, %arg6: memref<3x32xf32, #tpu.memory_space<vmem>>, %arg7: memref<3x1xf32, #tpu.memory_space<vmem>>, %arg8: memref<3x512xf32, #tpu.memory_space<vmem>>) attributes {dimension_semantics = [#tpu.dimension_semantics<parallel>], iteration_bounds = array<i64: 2>, scalar_prefetch = 0 : i64, scratch_operands = 0 : i64, tpu.core_type = #tpu.core_type<tc>, window_params = [{transform_indices = @transform_0, window_bounds = array<i64: 32, 512>}, {pipeline_mode = #tpu.pipeline_mode<synchronous>, transform_indices = @transform_1, window_bounds = array<i64: 32, 96>}, {pipeline_mode = #tpu.pipeline_mode<synchronous>, transform_indices = @transform_2, window_bounds = array<i64: 32, 1>}, {pipeline_mode = #tpu.pipeline_mode<synchronous>, transform_indices = @transform_3, window_bounds = array<i64: 4, 32, 96>}, {pipeline_mode = #tpu.pipeline_mode<synchronous>, transform_indices = @transform_4, window_bounds = array<i64: 4, 32, 1>}, {pipeline_mode = #tpu.pipeline_mode<synchronous>, transform_indices = @transform_5, window_bounds = array<i64: 3, 32>}, {pipeline_mode = #tpu.pipeline_mode<synchronous>, transform_indices = @transform_6, window_bounds = array<i64: 3, 1>}, {transform_indices = @transform_7, window_bounds = array<i64: 3, 512>}]} {
    %0 = tpu.iota {dimensions = array<i32: 1>} : vector<32x512xi32>
    %c128_i32 = arith.constant 128 : i32
    %c0_i32 = arith.constant 0 : i32
    %1 = arith.cmpi eq, %c128_i32, %c0_i32 : i32
    %c1_i32 = arith.constant 1 : i32
    %2 = arith.select %1, %c1_i32, %c128_i32 : i32
    %3 = vector.broadcast %2 : i32 to vector<32x512xi32>
    %4 = arith.remsi %0, %3 : vector<32x512xi32>
    %c0_i32_0 = arith.constant 0 : i32
    %5 = vector.broadcast %c0_i32_0 : i32 to vector<32x512xi32>
    %6 = arith.cmpi ne, %4, %5 : vector<32x512xi32>
    %c0_i32_1 = arith.constant 0 : i32
    %7 = vector.broadcast %c0_i32_1 : i32 to vector<32x512xi32>
    %8 = arith.cmpi slt, %4, %7 : vector<32x512xi32>
    %c0_i32_2 = arith.constant 0 : i32
    %9 = arith.cmpi slt, %2, %c0_i32_2 : i32
    %10 = vector.broadcast %9 : i1 to vector<32x512xi1>
    %11 = vector.broadcast %10 : vector<32x512xi1> to vector<32x512xi1>
    %12 = arith.xori %8, %11 : vector<32x512xi1>
    %13 = arith.andi %12, %6 : vector<32x512xi1>
    %14 = vector.broadcast %2 : i32 to vector<32x512xi32>
    %15 = arith.addi %4, %14 : vector<32x512xi32>
    %16 = arith.select %13, %15, %4 : vector<32x512xi1>, vector<32x512xi32>
    %c0_i32_3 = arith.constant 0 : i32
    %17 = vector.broadcast %c0_i32_3 : i32 to vector<32x512xi32>
    %18 = arith.cmpi ne, %16, %17 : vector<32x512xi32>
    %c127_i32 = arith.constant 127 : i32
    %19 = vector.broadcast %c127_i32 : i32 to vector<32x512xi32>
    %20 = arith.cmpi ne, %16, %19 : vector<32x512xi32>
    %c0 = arith.constant 0 : index
    %c0_4 = arith.constant 0 : index
    %21 = vector.load %arg1[%c0, %c0_4] : memref<32x512xf32, #tpu.memory_space<vmem>>, vector<32x512xf32>
    %c0_5 = arith.constant 0 : index
    %c0_6 = arith.constant 0 : index
    %22 = vector.load %arg2[%c0_5, %c0_6] : memref<32x96xf32, #tpu.memory_space<vmem>>, vector<32x96xf32>
    %c0_7 = arith.constant 0 : index
    %c0_8 = arith.constant 0 : index
    %23 = vector.load %arg3[%c0_7, %c0_8] : memref<32x1xf32, #tpu.memory_space<vmem>>, vector<32x1xf32>
    %c1_i32_9 = arith.constant 1 : i32
    %24 = tpu.dynamic_rotate %21 by %c1_i32_9 dim 1 : vector<32x512xf32>, i32 -> vector<32x512xf32>
    %cst = arith.constant 0.000000e+00 : f32
    %25 = vector.broadcast %cst : f32 to vector<32x512xf32>
    %26 = arith.select %18, %24, %25 : vector<32x512xi1>, vector<32x512xf32>
    %c511_i32 = arith.constant 511 : i32
    %27 = tpu.dynamic_rotate %21 by %c511_i32 dim 1 : vector<32x512xf32>, i32 -> vector<32x512xf32>
    %cst_10 = arith.constant 0.000000e+00 : f32
    %28 = vector.broadcast %cst_10 : f32 to vector<32x512xf32>
    %29 = arith.select %20, %27, %28 : vector<32x512xi1>, vector<32x512xf32>
    %30 = tpu.concatenate %26, %21, %29 in 0 : vector<32x512xf32>, vector<32x512xf32>, vector<32x512xf32> -> vector<96x512xf32>
    %cst_11 = arith.constant dense<0.000000e+00> : vector<32x512xf32>
    %31 = tpu.matmul %22, %30, %cst_11 {dimension_numbers = #tpu.dot_dimension_numbers<[1], [0], [0], [1], [0, 0, 1, 1], [], []>} : vector<32x96xf32>, vector<96x512xf32>, vector<32x512xf32> -> vector<32x512xf32>
    %32 = vector.broadcast %23 : vector<32x1xf32> to vector<32x512xf32>
    %33 = arith.addf %31, %32 : vector<32x512xf32>
    %c0_12 = arith.constant 0 : index
    %c0_13 = arith.constant 0 : index
    %c0_14 = arith.constant 0 : index
    %34 = vector.load %arg4[%c0_12, %c0_13, %c0_14] : memref<4x32x96xf32, #tpu.memory_space<vmem>>, vector<1x32x96xf32>
    %35 = vector.shape_cast %34 : vector<1x32x96xf32> to vector<32x96xf32>
    %c0_15 = arith.constant 0 : index
    %c0_16 = arith.constant 0 : index
    %c0_17 = arith.constant 0 : index
    %36 = vector.load %arg5[%c0_15, %c0_16, %c0_17] : memref<4x32x1xf32, #tpu.memory_space<vmem>>, vector<1x32x1xf32>
    %37 = vector.shape_cast %36 : vector<1x32x1xf32> to vector<32x1xf32>
    %c1_i32_18 = arith.constant 1 : i32
    %38 = tpu.dynamic_rotate %33 by %c1_i32_18 dim 1 : vector<32x512xf32>, i32 -> vector<32x512xf32>
    %cst_19 = arith.constant 0.000000e+00 : f32
    %39 = vector.broadcast %cst_19 : f32 to vector<32x512xf32>
    %40 = arith.select %18, %38, %39 : vector<32x512xi1>, vector<32x512xf32>
    %c511_i32_20 = arith.constant 511 : i32
    %41 = tpu.dynamic_rotate %33 by %c511_i32_20 dim 1 : vector<32x512xf32>, i32 -> vector<32x512xf32>
    %cst_21 = arith.constant 0.000000e+00 : f32
    %42 = vector.broadcast %cst_21 : f32 to vector<32x512xf32>
    %43 = arith.select %20, %41, %42 : vector<32x512xi1>, vector<32x512xf32>
    %44 = tpu.concatenate %40, %33, %43 in 0 : vector<32x512xf32>, vector<32x512xf32>, vector<32x512xf32> -> vector<96x512xf32>
    %cst_22 = arith.constant dense<0.000000e+00> : vector<32x512xf32>
    %45 = tpu.matmul %35, %44, %cst_22 {dimension_numbers = #tpu.dot_dimension_numbers<[1], [0], [0], [1], [0, 0, 1, 1], [], []>} : vector<32x96xf32>, vector<96x512xf32>, vector<32x512xf32> -> vector<32x512xf32>
    %46 = vector.broadcast %37 : vector<32x1xf32> to vector<32x512xf32>
    %47 = arith.addf %45, %46 : vector<32x512xf32>
    %cst_23 = arith.constant 0.000000e+00 : f32
    %48 = vector.broadcast %cst_23 : f32 to vector<32x512xf32>
    %49 = arith.maximumf %47, %48 : vector<32x512xf32>
    %c1 = arith.constant 1 : index
    %c0_24 = arith.constant 0 : index
    %c0_25 = arith.constant 0 : index
    %50 = vector.load %arg4[%c1, %c0_24, %c0_25] : memref<4x32x96xf32, #tpu.memory_space<vmem>>, vector<1x32x96xf32>
    %51 = vector.shape_cast %50 : vector<1x32x96xf32> to vector<32x96xf32>
    %c1_26 = arith.constant 1 : index
    %c0_27 = arith.constant 0 : index
    %c0_28 = arith.constant 0 : index
    %52 = vector.load %arg5[%c1_26, %c0_27, %c0_28] : memref<4x32x1xf32, #tpu.memory_space<vmem>>, vector<1x32x1xf32>
    %53 = vector.shape_cast %52 : vector<1x32x1xf32> to vector<32x1xf32>
    %c1_i32_29 = arith.constant 1 : i32
    %54 = tpu.dynamic_rotate %49 by %c1_i32_29 dim 1 : vector<32x512xf32>, i32 -> vector<32x512xf32>
    %cst_30 = arith.constant 0.000000e+00 : f32
    %55 = vector.broadcast %cst_30 : f32 to vector<32x512xf32>
    %56 = arith.select %18, %54, %55 : vector<32x512xi1>, vector<32x512xf32>
    %c511_i32_31 = arith.constant 511 : i32
    %57 = tpu.dynamic_rotate %49 by %c511_i32_31 dim 1 : vector<32x512xf32>, i32 -> vector<32x512xf32>
    %cst_32 = arith.constant 0.000000e+00 : f32
    %58 = vector.broadcast %cst_32 : f32 to vector<32x512xf32>
    %59 = arith.select %20, %57, %58 : vector<32x512xi1>, vector<32x512xf32>
    %60 = tpu.concatenate %56, %49, %59 in 0 : vector<32x512xf32>, vector<32x512xf32>, vector<32x512xf32> -> vector<96x512xf32>
    %cst_33 = arith.constant dense<0.000000e+00> : vector<32x512xf32>
    %61 = tpu.matmul %51, %60, %cst_33 {dimension_numbers = #tpu.dot_dimension_numbers<[1], [0], [0], [1], [0, 0, 1, 1], [], []>} : vector<32x96xf32>, vector<96x512xf32>, vector<32x512xf32> -> vector<32x512xf32>
    %62 = vector.broadcast %53 : vector<32x1xf32> to vector<32x512xf32>
    %63 = arith.addf %61, %62 : vector<32x512xf32>
    %cst_34 = arith.constant 0.000000e+00 : f32
    %64 = vector.broadcast %cst_34 : f32 to vector<32x512xf32>
    %65 = arith.maximumf %63, %64 : vector<32x512xf32>
    %c2 = arith.constant 2 : index
    %c0_35 = arith.constant 0 : index
    %c0_36 = arith.constant 0 : index
    %66 = vector.load %arg4[%c2, %c0_35, %c0_36] : memref<4x32x96xf32, #tpu.memory_space<vmem>>, vector<1x32x96xf32>
    %67 = vector.shape_cast %66 : vector<1x32x96xf32> to vector<32x96xf32>
    %c2_37 = arith.constant 2 : index
    %c0_38 = arith.constant 0 : index
    %c0_39 = arith.constant 0 : index
    %68 = vector.load %arg5[%c2_37, %c0_38, %c0_39] : memref<4x32x1xf32, #tpu.memory_space<vmem>>, vector<1x32x1xf32>
    %69 = vector.shape_cast %68 : vector<1x32x1xf32> to vector<32x1xf32>
    %c1_i32_40 = arith.constant 1 : i32
    %70 = tpu.dynamic_rotate %65 by %c1_i32_40 dim 1 : vector<32x512xf32>, i32 -> vector<32x512xf32>
    %cst_41 = arith.constant 0.000000e+00 : f32
    %71 = vector.broadcast %cst_41 : f32 to vector<32x512xf32>
    %72 = arith.select %18, %70, %71 : vector<32x512xi1>, vector<32x512xf32>
    %c511_i32_42 = arith.constant 511 : i32
    %73 = tpu.dynamic_rotate %65 by %c511_i32_42 dim 1 : vector<32x512xf32>, i32 -> vector<32x512xf32>
    %cst_43 = arith.constant 0.000000e+00 : f32
    %74 = vector.broadcast %cst_43 : f32 to vector<32x512xf32>
    %75 = arith.select %20, %73, %74 : vector<32x512xi1>, vector<32x512xf32>
    %76 = tpu.concatenate %72, %65, %75 in 0 : vector<32x512xf32>, vector<32x512xf32>, vector<32x512xf32> -> vector<96x512xf32>
    %cst_44 = arith.constant dense<0.000000e+00> : vector<32x512xf32>
    %77 = tpu.matmul %67, %76, %cst_44 {dimension_numbers = #tpu.dot_dimension_numbers<[1], [0], [0], [1], [0, 0, 1, 1], [], []>} : vector<32x96xf32>, vector<96x512xf32>, vector<32x512xf32> -> vector<32x512xf32>
    %78 = vector.broadcast %69 : vector<32x1xf32> to vector<32x512xf32>
    %79 = arith.addf %77, %78 : vector<32x512xf32>
    %cst_45 = arith.constant 0.000000e+00 : f32
    %80 = vector.broadcast %cst_45 : f32 to vector<32x512xf32>
    %81 = arith.maximumf %79, %80 : vector<32x512xf32>
    %c3 = arith.constant 3 : index
    %c0_46 = arith.constant 0 : index
    %c0_47 = arith.constant 0 : index
    %82 = vector.load %arg4[%c3, %c0_46, %c0_47] : memref<4x32x96xf32, #tpu.memory_space<vmem>>, vector<1x32x96xf32>
    %83 = vector.shape_cast %82 : vector<1x32x96xf32> to vector<32x96xf32>
    %c3_48 = arith.constant 3 : index
    %c0_49 = arith.constant 0 : index
    %c0_50 = arith.constant 0 : index
    %84 = vector.load %arg5[%c3_48, %c0_49, %c0_50] : memref<4x32x1xf32, #tpu.memory_space<vmem>>, vector<1x32x1xf32>
    %85 = vector.shape_cast %84 : vector<1x32x1xf32> to vector<32x1xf32>
    %c1_i32_51 = arith.constant 1 : i32
    %86 = tpu.dynamic_rotate %81 by %c1_i32_51 dim 1 : vector<32x512xf32>, i32 -> vector<32x512xf32>
    %cst_52 = arith.constant 0.000000e+00 : f32
    %87 = vector.broadcast %cst_52 : f32 to vector<32x512xf32>
    %88 = arith.select %18, %86, %87 : vector<32x512xi1>, vector<32x512xf32>
    %c511_i32_53 = arith.constant 511 : i32
    %89 = tpu.dynamic_rotate %81 by %c511_i32_53 dim 1 : vector<32x512xf32>, i32 -> vector<32x512xf32>
    %cst_54 = arith.constant 0.000000e+00 : f32
    %90 = vector.broadcast %cst_54 : f32 to vector<32x512xf32>
    %91 = arith.select %20, %89, %90 : vector<32x512xi1>, vector<32x512xf32>
    %92 = tpu.concatenate %88, %81, %91 in 0 : vector<32x512xf32>, vector<32x512xf32>, vector<32x512xf32> -> vector<96x512xf32>
    %cst_55 = arith.constant dense<0.000000e+00> : vector<32x512xf32>
    %93 = tpu.matmul %83, %92, %cst_55 {dimension_numbers = #tpu.dot_dimension_numbers<[1], [0], [0], [1], [0, 0, 1, 1], [], []>} : vector<32x96xf32>, vector<96x512xf32>, vector<32x512xf32> -> vector<32x512xf32>
    %94 = vector.broadcast %85 : vector<32x1xf32> to vector<32x512xf32>
    %95 = arith.addf %93, %94 : vector<32x512xf32>
    %cst_56 = arith.constant 0.000000e+00 : f32
    %96 = vector.broadcast %cst_56 : f32 to vector<32x512xf32>
    %97 = arith.maximumf %95, %96 : vector<32x512xf32>
    %c0_57 = arith.constant 0 : index
    %c0_58 = arith.constant 0 : index
    %98 = vector.load %arg6[%c0_57, %c0_58] : memref<3x32xf32, #tpu.memory_space<vmem>>, vector<3x32xf32>
    %cst_59 = arith.constant dense<0.000000e+00> : vector<3x512xf32>
    %99 = tpu.matmul %98, %97, %cst_59 {dimension_numbers = #tpu.dot_dimension_numbers<[1], [0], [0], [1], [0, 0, 1, 1], [], []>} : vector<3x32xf32>, vector<32x512xf32>, vector<3x512xf32> -> vector<3x512xf32>
    %c0_60 = arith.constant 0 : index
    %c0_61 = arith.constant 0 : index
    %100 = vector.load %arg7[%c0_60, %c0_61] : memref<3x1xf32, #tpu.memory_space<vmem>>, vector<3x1xf32>
    %101 = vector.broadcast %100 : vector<3x1xf32> to vector<3x512xf32>
    %102 = arith.addf %99, %101 : vector<3x512xf32>
    %c0_62 = arith.constant 0 : index
    %c0_63 = arith.constant 0 : index
    %103 = vector.load %arg8[%c0_62, %c0_63] : memref<3x512xf32, #tpu.memory_space<vmem>>, vector<3x512xf32>
    tpu.vector_store %arg8[%c0_62, %c0_63], %102 {strides = array<i32>} : memref<3x512xf32, #tpu.memory_space<vmem>>, vector<3x512xf32>,
    return
  }
  func.func @transform_0(%arg0: i32) -> (i32, i32) {
    %c0_i32 = arith.constant 0 : i32
    %c0_i32_0 = arith.constant 0 : i32
    return %c0_i32, %arg0 : i32, i32
  }
  func.func @transform_1(%arg0: i32) -> (i32, i32) {
    %c0_i32 = arith.constant 0 : i32
    %c0_i32_0 = arith.constant 0 : i32
    %c0_i32_1 = arith.constant 0 : i32
    return %c0_i32, %c0_i32_0 : i32, i32
  }
  func.func @transform_2(%arg0: i32) -> (i32, i32) {
    %c0_i32 = arith.constant 0 : i32
    %c0_i32_0 = arith.constant 0 : i32
    %c0_i32_1 = arith.constant 0 : i32
    return %c0_i32, %c0_i32_0 : i32, i32
  }
  func.func @transform_3(%arg0: i32) -> (i32, i32, i32) {
    %c0_i32 = arith.constant 0 : i32
    %c0_i32_0 = arith.constant 0 : i32
    %c0_i32_1 = arith.constant 0 : i32
    %c0_i32_2 = arith.constant 0 : i32
    return %c0_i32, %c0_i32_0, %c0_i32_1 : i32, i32, i32
  }
  func.func @transform_4(%arg0: i32) -> (i32, i32, i32) {
    %c0_i32 = arith.constant 0 : i32
    %c0_i32_0 = arith.constant 0 : i32
    %c0_i32_1 = arith.constant 0 : i32
    %c0_i32_2 = arith.constant 0 : i32
    return %c0_i32, %c0_i32_0, %c0_i32_1 : i32, i32, i32
  }
  func.func @transform_5(%arg0: i32) -> (i32, i32) {
    %c0_i32 = arith.constant 0 : i32
    %c0_i32_0 = arith.constant 0 : i32
    %c0_i32_1 = arith.constant 0 : i32
    return %c0_i32, %c0_i32_0 : i32, i32
  }
  func.func @transform_6(%arg0: i32) -> (i32, i32) {
    %c0_i32 = arith.constant 0 : i32
    %c0_i32_0 = arith.constant 0 : i32
    %c0_i32_1 = arith.constant 0 : i32
    return %c0_i32, %c0_i32_0 : i32, i32
  }
  func.func @transform_7(%arg0: i32) -> (i32, i32) {
    %c0_i32 = arith.constant 0 : i32
    %c0_i32_0 = arith.constant 0 : i32
    return %c0_i32, %arg0 : i32, i32
  }
}

</mosaic_0001>

<bundles_post_ra>
// kernel: tpu_custom_call.1
= control target key start
LH: loop header
LB: loop body
LE: loop exit
PB: predicated region body
PF: predicated region fallthrough
CT: control target
= control target key end

     0   :  { %12 = vsyncpa [#allocation3], 0  ;;  %s4882_s0 = inlined_call_operand.hbm [shape: f32[32,1024], index: 0, kind: input, shape index: {}]   ;;  %s4883_s1 = inlined_call_operand.vmem [shape: f32[32,96], index: 1, kind: input, shape index: {}]   ;;  %s4884_s2 = inlined_call_operand.vmem [shape: f32[32,1], index: 2, kind: input, shape index: {}]   ;;  %s4885_s3 = inlined_call_operand.vmem [shape: f32[4,32,96], index: 3, kind: input, shape index: {}]   ;;  %s4886_s4 = inlined_call_operand.vmem [shape: f32[4,32,1], index: 4, kind: input, shape index: {}]   ;;  %s4887_s5 = inlined_call_operand.vmem [shape: f32[3,32], index: 5, kind: input, shape index: {}]   ;;  %s4888_s6 = inlined_call_operand.vmem [shape: f32[3,1], index: 6, kind: input, shape index: {}]   ;;  %s4889_s7 = inlined_call_operand.hbm [shape: f32[3,1024], index: 7, kind: output, shape index: {}]  }
   0x1   :  { %14 = vsyncpa [#allocation3 + $0x1], 0 }
   0x2   :  { %15 = vsyncpa [#allocation4], 0 }
   0x3   :  { %17 = vsyncpa [#allocation4 + $0x1], 0  ;;  %s3607_s24 = smov 0   ;;  %s3609_s25 = smov 0  }
   0x4   :  { %s3611_s26 = smov 0   ;;  %s3613_s27 = smov 0  }
   0x5 LB: > { %s3628_s28 = sadd.s32 4294967295, %s3556_s27   ;;  %s2427_s29 = sadd.s32 4294967294, %s3556_s27   ;;  %s3556_s27 = sphi %s3613_s27, %s4927_s27   ;;  %s3552_s26 = sphi %s3611_s26, %s4926_s26   ;;  %s3548_s25 = sphi %s3609_s25, %s4925_s25   ;;  %s3544_s24 = sphi %s3607_s24, %s4924_s24  }
   0x6   : > { %s3632_s30 = sadd.s32 1, %s3556_s27   ;;  %s30_s8 = sadd.s32 1, %s3552_s26 }
   0x7   : > { %s27_s9 = ssub.s32 %s3556_s27, %s3632_s30  ;;  %p37_p0 = scmp.ne.s32.totalorder %s3552_s26, %s3548_s25 }
   0x8   : > { %p28_p1 = scmp.eq.s32.totalorder %s27_s9, 0  ;;  %p38_p2 = scmp.eq.s32.totalorder %s3556_s27, 0 }
   0x9   : > { %p43_p3 = scmp.ne.s32.totalorder %s3548_s25, %s3544_s24  ;;  %p44_p4 = scmp.eq.s32.totalorder %s3628_s28, 0 }
   0xa   : > { %s3644_s10 = scalar_select %p28_p1, %s3552_s26, %s30_s8  }
   0xb   : > { %p3646_p5 = por %p38_p2, %p37_p0  ;;  %p3650_p6 = por %p44_p4, %p43_p3 }
   0xc   : > { %p193_p7 = scmp.eq.s32.totalorder %s3628_s28, 1  ;;  %p199_p8 = scmp.eq.s32.totalorder %s2427_s29, 1 }
   0xd   : > { %p3017_p10 = scmp.lt.s32.totalorder %s3556_s27, 2  ;;  %s237_s15 = sand.u32 1, %s3552_s26  }
   0xe   : > { %p3657_p11 = por %p193_p7, %p37_p0  ;;  %p3661_p12 = por %p199_p8, %p43_p3 }
   0xf   : > { %s2667_s16 = sshll.u32 %s3556_s27, 9  ;;  %s2430_s17 = sshll.u32 %s237_s15, 7 }
  0x10   : > { %s4893_s13 = scalar_select %p3657_p11, 1, 0 }
  0x11   : > { %s4894_s14 = scalar_select %p3661_p12, 1, 0 }
  0x12   : > { %s3670_s20 = scalar_lea.hbm %s4882_s0, %s2667_s16  ;;  %s241_s21 = scalar_lea.vmem [#allocation2], %s2430_s17 }
  0x13   : > { %s248_s22 = sshll.u32 %s241_s21, 4  ;;  %p3674_p13 = pnand %p3017_p10, %p3646_p5  ;;  %s3678_s22 = int_to_ptr.vmem [resolvable:$true] %s248_s22 }
  0x14   : > { %s3681_s29 = scalar_lea.sflag [#allocation3], %s237_s15  ;;  %s3460_s8 = scalar_lea.hbm %s3670_s20, 2048 }
  0x15   : > { %p3461_p1 = scmp.ne.s32.totalorder %s3670_s20, %s3460_s8  ;;  %p3462_p2 = pneg %p3674_p13 }
  0x16   : > { %s3465_s16 = scalar_lea.hbm %s4882_s0, 4096  ;;  %p3466_p5 = scmp.lt.u32.totalorder %s3670_s20, %s4882_s0 }
  0x17   : > { %p3463_p3 = pnand %p3462_p2, %p3461_p1  ;;  %p3467_p7 = scmp.lt.u32.totalorder %s3465_s16, %s3460_s8 }
  0x18   : > { %p3469_p10 = scmp.lt.u32.totalorder %s3460_s8, %s3670_s20 }
  0x19   : > { %p3464_p4 = pneg %p3463_p3  ;;  %p3468_p8 = por %p3467_p7, %p3466_p5 }
  0x1b   : > { %p3470_p9 = por %p3469_p10, %p3468_p8 }
  0x1d   : > { %p3471_p0 = pnand %p3470_p9, %p3464_p4 }
  0x1f   : > { %3474 = shalt.err (!%p3471_p0)
}
  0x20   : > { %s3475_s15 = scalar_lea.vmem %s3678_s22, 2048  ;;  %s3558_s19 = smov [#allocation2]  }
  0x21   : > { %p3476_p1 = scmp.ne.s32.totalorder %s3678_s22, %s3475_s15  ;;  %s3480_s21 = sshll.u32 %s3558_s19, 4  ;;  %s3481_s21 = int_to_ptr.vmem [resolvable:$false] %s3480_s21 }
  0x22   : > { %s3482_s9 = scalar_lea.vmem %s3481_s21, 4096  ;;  %p3483_p11 = scmp.lt.s32.totalorder %s3678_s22, %s3481_s21 }
  0x23   : > { %p3478_p3 = pnand %p3476_p1, %p3462_p2  ;;  %p3484_p5 = scmp.lt.s32.totalorder %s3482_s9, %s3475_s15 }
  0x25   : > { %p3479_p12 = pneg %p3478_p3  ;;  %p3485_p7 = por %p3484_p5, %p3483_p11 }
  0x27   : > { %p3486_p8 = pnand %p3485_p7, %p3479_p12 }
  0x29   : > { %3489 = shalt.err (!%p3486_p8)
}
  0x2a   : > { %s3559_s8 = smov 1024   ;;  %s3560_s11 = smov 512  }
  0x2b   : > { %s3561_s16 = smov 32   ;;  %p256_p9 = scmp.lt.s32.totalorder %s3556_s27, 3 }
  0x2c   : > { %3012 = dma.hbm_to_vmem [thread:$0]  (!%p3674_p13), %s3670_s20, 2048, %s3678_s22, %s3681_s29, %s3559_s8, %s3560_s11, %s3561_s16  }
  0x2d   : > { %p4896_p0 = scmp.ge.s32.totalorder %s3556_s27, 1 }
  0x2f   : > { %p257_p2 = pnand %p4896_p0, %p256_p9 }
  0x30   : > { %s3713_s17 = sand.u32 (!%p257_p2), 1, %s3548_s25  }
  0x31   : > { %260 = sbr.rel (%p257_p2) target bundleno = 2176 (0x880), region = 48  ;;  %s2434_s18 = sshll.u32 (!%p257_p2), %s3713_s17, 7 }
  0x32   : > { %s263_s15 = scalar_lea.sflag (!%p257_p2), [#allocation3], %s3713_s17  ;;  %s266_s19 = scalar_lea.vmem (!%p257_p2), [#allocation2], %s2434_s18 }
  0x38   : > { %3535 = dma.done.wait (%p3650_p6), %s263_s15, 2048  }
  0x39   : > { %3537 = vsyncadd (%p3650_p6), %s263_s15, 4294965248  ;;  %v3721_v0 = vld [vmem:[%s266_s19 + $0x10] sm:$0xff]  ;;  %v3725_v2 = vld [vmem:[%s266_s19] sm:$0xff]  ;;  %s3562_s12 = smov 1   ;;  %s3563_s20 = smov 127   ;;  %v3564_v32 = vmov 0.0   ;;  %v299_v38 = vlaneseq }
  0x3a   : > { %v3723_v1 = vld [vmem:[%s266_s19 + $0x30] sm:$0xff]  ;;  %v3729_v4 = vld [vmem:[%s266_s19 + $0x20] sm:$0xff]  ;;  %v3731_v5 = vld [vmem:[%s266_s19 + $0x18] sm:$0xff]  ;;  %611 = vmatprep.mubr.f32.mxu0 %v3564_v32  ;;  %700 = vmatprep.mubr.f32.mxu1 %v3564_v32  ;;  %v3565_v35 = vmov 0   ;;  %s2435_s9 = sshll.u32 %s3713_s17, 4  ;;  %p4921_p11 = scmp.ne.s32.totalorder %s4893_s13, 0 }
  0x3b   : > { %v3068_v3 = vpack.i.bf16 %v3723_v1, %v3721_v0  ;;  %v3733_v6 = vld [vmem:[%s266_s19 + $0x38] sm:$0xff]  ;;  %v3058_v7 = vpack.i.bf16 %v3729_v4, %v3725_v2  ;;  %v3737_v8 = vld [vmem:[%s266_s19 + $0x8] sm:$0xff]  ;;  %v3751_v14 = vld [vmem:[%s266_s19 + $0x40] sm:$0xff]  ;;  %v2683_v25 = vpack.c.bf16 %v3729_v4, %v3725_v2  ;;  %v2715_v27 = vpack.c.bf16 %v3723_v1, %v3721_v0  ;;  %3139 = vset.pattern.permute.xlu1 %v3565_v35  ;;  %s296_s8 = scalar_lea.vmem [#allocation5], %s2435_s9 }
  0x3c   : > { %v3739_v9 = vld [vmem:[%s266_s19 + $0x28] sm:$0xff]  ;;  %v3073_v10 = vpack.i.bf16 %v3733_v6, %v3731_v5  ;;  %v3753_v15 = vld [vmem:[%s266_s19 + $0x60] sm:$0xff]  ;;  %v3761_v18 = vld [vmem:[%s266_s19 + $0x58] sm:$0xff]  ;;  %v2713_v26 = vpack.c.bf16 %v3733_v6, %v3731_v5  ;;  %3138 = vset.pattern.permute.xlu0 %v3565_v35  ;;  %v3815_v39 = vand.u32 127, %v299_v38  ;;  %s2357_s11 = sshll.u32 %s296_s8, 4  ;;  %s4840_s11 = int_to_ptr.vmem [resolvable:$true] %s2357_s11 }
  0x3d   : > { %3069 = vrot.lane.b32.xlu1 %v3068_v3, %s3562_s12  ;;  %3059 = vrot.lane.b32.xlu0 %v3058_v7, %s3562_s12  ;;  %v3063_v11 = vpack.i.bf16 %v3739_v9, %v3737_v8  ;;  %v3747_v12 = vld [vmem:[%s266_s19 + $0x48] sm:$0xff]  ;;  %v3078_v17 = vpack.i.bf16 %v3753_v15, %v3751_v14  ;;  %v3763_v19 = vld [vmem:[%s266_s19 + $0x78] sm:$0xff]  ;;  %v2681_v23 = vpack.c.bf16 %v3739_v9, %v3737_v8 }
  0x3e   : > { %v3749_v13 = vld [vmem:[%s266_s19 + $0x68] sm:$0xff]  ;;  %v3765_v20 = vld [vmem:[%s266_s19 + $0x50] sm:$0xff]  ;;  %v3093_v22 = vpack.i.bf16 %v3763_v19, %v3761_v18  ;;  %v2687_v29 = vpack.c.bf16 %v3753_v15, %v3751_v14  ;;  %v2717_v30 = vpack.c.bf16 %v3763_v19, %v3761_v18  ;;  %v380_v34 = vld [vmem:[%s4884_s2] sm:$0xff]  ;;  %v3818_v40 = vadd.s32 128, %v3815_v39 }
  0x3f   : > { %v3083_v16 = vpack.i.bf16 %v3749_v13, %v3747_v12  ;;  %v3767_v21 = vld [vmem:[%s266_s19 + $0x70] sm:$0xff]  ;;  %v2685_v28 = vpack.c.bf16 %v3749_v13, %v3747_v12  ;;  %v381_v33 = vld [vmem:[%s4884_s2 + $0x8] sm:$0xff]  ;;  %v383_v37 = vld [vmem:[%s4884_s2 + $0x18] sm:$0xff]  ;;  %v3821_v41 = vadd.s32 384, %v3815_v39  ;;  %v3824_v42 = vadd.s32 256, %v3815_v39  ;;  %s2343_s19 = scalar_lea.sflag [#allocation4], %s3713_s17 }
  0x40   : > { %v3088_v24 = vpack.i.bf16 %v3767_v21, %v3765_v20  ;;  %v2719_v31 = vpack.c.bf16 %v3767_v21, %v3765_v20  ;;  %v382_v36 = vld [vmem:[%s4884_s2 + $0x10] sm:$0xff]  ;;  %v315_v44 = vand.u32 127, %v3818_v40  ;;  %vm416_vm0 = vcmp.lt.s32.totalorder %v3815_v39, 1  ;;  %v2613_v0 = vld [vmem:[%s4885_s3 + $0x68] sm:$0xff] }
  0x41   : > { %3074 = vrot.lane.b32.xlu1 %v3073_v10, %s3562_s12  ;;  %3064 = vrot.lane.b32.xlu0 %v3063_v11, %s3562_s12  ;;  %v329_v45 = vand.u32 127, %v3821_v41  ;;  %v322_v47 = vand.u32 127, %v3824_v42  ;;  %vm352_vm3 = vcmp.ne.s32.totalorder %v3815_v39, 0  ;;  %vm481_vm9 = vcmp.lt.s32.totalorder %v3815_v39, 127  ;;  %v2614_v18 = vld [vmem:[%s4885_s3 + $0x70] sm:$0xff] }
  0x42   : > { %vm3832_vm1 = vcmp.ne.s32.totalorder %v315_v44, 0  ;;  %vm3871_vm7 = vmpackc.low %vm352_vm3, %vm352_vm3  ;;  %vm357_vm10 = vcmp.ne.s32.totalorder %v315_v44, 127  ;;  %vm356_vm12 = vcmp.ne.s32.totalorder %v3815_v39, 127  ;;  %vm534_vm3 = vcmask 785408   ;;  %v2612_v39 = vld [vmem:[%s4885_s3 + $0x60] sm:$0xff]  ;;  %v2615_v44 = vld [vmem:[%s4885_s3 + $0x78] sm:$0xff] }
  0x43   : > { %vm355_vm2 = vcmp.ne.s32.totalorder %v329_v45, 0  ;;  %vm3841_vm4 = vcmp.ne.s32.totalorder %v322_v47, 0  ;;  %vm3864_vm6 = vmpackc.low %vm3832_vm1, %vm3832_vm1  ;;  %vm3939_vm11 = vcmp.ne.s32.totalorder %v329_v45, 127  ;;  %vm3964_vm14 = vcmp.ne.s32.totalorder %v322_v47, 127 }
  0x44   : > { %vm3849_vm5 = vmpackc.low %vm355_vm2, %vm355_vm2 }
  0x45   : > { %3084 = vrot.lane.b32.xlu1 %v3083_v16, %s3562_s12  ;;  %3079 = vrot.lane.b32.xlu0 %v3078_v17, %s3562_s12  ;;  %vm3884_vm8 = vmpackc.low %vm3841_vm4, %vm3841_vm4 }
  0x46   : > { %vm3958_vm13 = vmpackc.low %vm357_vm10, %vm357_vm10 }
  0x47   : > { %vm3978_vm15 = vmpackc.low %vm3939_vm11, %vm3939_vm11 }
  0x48   : > { %vm3985_vm1 = vmpackc.low %vm356_vm12, %vm356_vm12 }
  0x49   : > { %3094 = vrot.lane.b32.xlu1 %v3093_v22, %s3562_s12  ;;  %3089 = vrot.lane.b32.xlu0 %v3088_v24, %s3562_s12  ;;  %vm3999_vm2 = vmpackc.low %vm3964_vm14, %vm3964_vm14 }
  0x4d   : > { %3104 = vrot.lane.b32.xlu1 %v3063_v11, %s3563_s20  ;;  %3099 = vrot.lane.b32.xlu0 %v3058_v7, %s3563_s20 }
  0x51   : > { %3114 = vrot.lane.b32.xlu1 %v3073_v10, %s3563_s20  ;;  %3109 = vrot.lane.b32.xlu0 %v3068_v3, %s3563_s20 }
  0x55   : > { %3124 = vrot.lane.b32.xlu1 %v3083_v16, %s3563_s20  ;;  %3119 = vrot.lane.b32.xlu0 %v3078_v17, %s3563_s20 }
  0x59   : > { %3134 = vrot.lane.b32.xlu1 %v3093_v22, %s3563_s20  ;;  %3129 = vrot.lane.b32.xlu0 %v3088_v24, %s3563_s20 }
  0x5d   : > { %521 = vperm.xlu1 %3139, %v381_v33   ;;  %516 = vperm.xlu0 %3138, %v380_v34  }
  0x61   : > { %526 = vperm.xlu1 %3139, %v382_v36   ;;  %531 = vperm.xlu0 %3138, %v383_v37  }
  0xaf   : > { %v3070_v43 = vpop.permute.xlu1 %3069  ;;  %v3060_v46 = vpop.permute.xlu0 %3059 }
  0xb0   : > { %v3072_v48 = vunpack.i.h.bf16 %v3070_v43  ;;  %v3071_v49 = vunpack.i.l.bf16 %v3070_v43  ;;  %v3062_v52 = vunpack.i.h.bf16 %v3060_v46  ;;  %v3061_v53 = vunpack.i.l.bf16 %v3060_v46 }
  0xb3   : > { %v3075_v50 = vpop.permute.xlu1 %3074  ;;  %v3065_v56 = vpop.permute.xlu0 %3064 }
  0xb4   : > { %v3077_v54 = vunpack.i.h.bf16 %v3075_v50  ;;  %v3076_v55 = vunpack.i.l.bf16 %v3075_v50  ;;  %v3067_v57 = vunpack.i.h.bf16 %v3065_v56  ;;  %v3066_v58 = vunpack.i.l.bf16 %v3065_v56 }
  0xb6   : > { %v417_v60 = vsel %vm416_vm0, %v3071_v49, %v3076_v55  ;;  %v418_v61 = vsel %vm416_vm0, %v3072_v48, %v3077_v54  ;;  %v429_v63 = vsel %vm416_vm0, %v3076_v55, %v3061_v53  ;;  %v430_v3 = vsel %vm416_vm0, %v3077_v54, %v3062_v52 }
  0xb7   : > { %v3085_v7 = vpop.permute.xlu1 %3084  ;;  %v425_v10 = vsel %vm416_vm0, %v3061_v53, %v3066_v58  ;;  %v426_v11 = vsel %vm416_vm0, %v3062_v52, %v3067_v57  ;;  %v2701_v17 = vpack.c.bf16 %v418_v61, %v417_v60  ;;  %v2672_v22 = vpack.c.bf16 %v430_v3, %v429_v63  ;;  %v3080_v34 = vpop.permute.xlu0 %3079 }
  0xb8   : > { %v3087_v24 = vunpack.i.h.bf16 %v3085_v7  ;;  %v3086_v33 = vunpack.i.l.bf16 %v3085_v7  ;;  %v2669_v35 = vpack.c.bf16 %v426_v11, %v425_v10  ;;  %v421_v37 = vsel %vm416_vm0, %v3066_v58, %v3071_v49 }
  0xb9   : > { %v3082_v38 = vunpack.i.h.bf16 %v3080_v34  ;;  %v3081_v43 = vunpack.i.l.bf16 %v3080_v34  ;;  %2703 = vmatprep.subr.msk.bf16.mxu1 %vm3849_vm5, %v2701_v17  ;;  %v422_v46 = vsel %vm416_vm0, %v3067_v57, %v3072_v48 }
  0xba   : > { %2671 = vmatprep.subr.msk.bf16.mxu0 %vm3864_vm6, %v2669_v35  ;;  %v2704_v51 = vpack.c.bf16 %v422_v46, %v421_v37 }
  0xbb   : > { %v428_v49 = vsel %vm416_vm0, %v3082_v38, %v3087_v24  ;;  %v427_v52 = vsel %vm416_vm0, %v3081_v43, %v3086_v33  ;;  %2674 = vmatpush1.bf16.msk.msra.mxu0 %vm3871_vm7, %v2672_v22  ;;  %v3095_v48 = vpop.permute.xlu1 %3094  ;;  %v3090_v56 = vpop.permute.xlu0 %3089 }
  0xbc   : > { %v2675_v53 = vpack.c.bf16 %v428_v49, %v427_v52  ;;  %2706 = vmatpush1.bf16.msk.msra.mxu1 %vm3884_vm8, %v2704_v51  ;;  %v3097_v54 = vunpack.i.h.bf16 %v3095_v48  ;;  %v3096_v55 = vunpack.i.l.bf16 %v3095_v48  ;;  %v3092_v57 = vunpack.i.h.bf16 %v3090_v56 }
  0xbd   : > { %v3091_v58 = vunpack.i.l.bf16 %v3090_v56 }
  0xbe   : > { %v431_v59 = vsel %vm416_vm0, %v3096_v55, %v3081_v43  ;;  %v432_v60 = vsel %vm416_vm0, %v3097_v54, %v3082_v38  ;;  %2677 = vmatprep.subr.msk.bf16.mxu0 %vm3864_vm6, %v2675_v53  ;;  %v420_v63 = vsel %vm416_vm0, %v3092_v57, %v3097_v54  ;;  %v424_v3 = vsel %vm416_vm0, %v3087_v24, %v3092_v57 }
  0xbf   : > { %v2678_v61 = vpack.c.bf16 %v432_v60, %v431_v59  ;;  %v419_v7 = vsel %vm416_vm0, %v3091_v58, %v3096_v55  ;;  %v3105_v10 = vpop.permute.xlu1 %3104  ;;  %v423_v11 = vsel %vm416_vm0, %v3086_v33, %v3091_v58  ;;  %v3100_v22 = vpop.permute.xlu0 %3099 }
  0xc0   : > { %v2707_v17 = vpack.c.bf16 %v420_v63, %v419_v7  ;;  %v2710_v34 = vpack.c.bf16 %v424_v3, %v423_v11  ;;  %v3107_v24 = vunpack.i.h.bf16 %v3105_v10  ;;  %v3106_v35 = vunpack.i.l.bf16 %v3105_v10  ;;  %v376_v7 = vld [vmem:[%s4883_s1] sm:$0xff]  ;;  %v377_v10 = vld [vmem:[%s4883_s1 + $0x8] sm:$0xff]  ;;  %v378_v11 = vld [vmem:[%s4883_s1 + $0x10] sm:$0xff] }
  0xc1   : > { %2680 = vmatpush1.bf16.msk.msra.mxu0 %vm3871_vm7, %v2678_v61  ;;  %v3102_v33 = vunpack.i.h.bf16 %v3100_v22  ;;  %v3101_v38 = vunpack.i.l.bf16 %v3100_v22 }
  0xc2   : > { %2709 = vmatprep.subr.msk.bf16.mxu1 %vm3849_vm5, %v2707_v17  ;;  %2682 = vmatprep.subr.bf16.mxu0 %v2681_v23  ;;  %v379_v17 = vld [vmem:[%s4883_s1 + $0x18] sm:$0xff] }
  0xc3   : > { %2712 = vmatpush1.bf16.msk.msra.mxu1 %vm3884_vm8, %v2710_v34  ;;  %v3115_v37 = vpop.permute.xlu1 %3114  ;;  %v3110_v51 = vpop.permute.xlu0 %3109  ;;  %v491_v6 = vsel %vm481_vm9, %v3102_v33, %v3107_v24  ;;  %v490_v12 = vsel %vm481_vm9, %v3101_v38, %v3106_v35 }
  0xc4   : > { %v3117_v43 = vunpack.i.h.bf16 %v3115_v37  ;;  %v3116_v46 = vunpack.i.l.bf16 %v3115_v37  ;;  %2714 = vmatprep.subr.bf16.mxu1 %v2713_v26  ;;  %v3112_v49 = vunpack.i.h.bf16 %v3110_v51  ;;  %v3111_v8 = vunpack.i.l.bf16 %v3110_v51 }
  0xc5   : > { %2684 = vmatpush1.bf16.msra.mxu0 %v2683_v25  ;;  %v2692_v14 = vpack.c.bf16 %v491_v6, %v490_v12 }
  0xc6   : > { %v494_v9 = vsel %vm481_vm9, %v3116_v46, %v3101_v38  ;;  %v495_v23 = vsel %vm481_vm9, %v3117_v43, %v3102_v33  ;;  %2686 = vmatprep.subr.bf16.mxu0 %v2685_v28  ;;  %v487_v2 = vsel %vm481_vm9, %v3107_v24, %v3112_v49  ;;  %v486_v13 = vsel %vm481_vm9, %v3106_v35, %v3111_v8 }
  0xc7   : > { %2716 = vmatpush1.bf16.msra.mxu1 %v2715_v27  ;;  %v3125_v4 = vpop.permute.xlu1 %3124  ;;  %v3120_v25 = vpop.permute.xlu0 %3119  ;;  %v2721_v26 = vpack.c.bf16 %v495_v23, %v494_v9  ;;  %v483_v27 = vsel %vm481_vm9, %v3112_v49, %v3117_v43  ;;  %v482_v28 = vsel %vm481_vm9, %v3111_v8, %v3116_v46  ;;  %v2689_v40 = vpack.c.bf16 %v487_v2, %v486_v13 }
  0xc8   : > { %2718 = vmatprep.subr.bf16.mxu1 %v2717_v30  ;;  %v3127_v19 = vunpack.i.h.bf16 %v3125_v4  ;;  %v3126_v30 = vunpack.i.l.bf16 %v3125_v4  ;;  %v3122_v41 = vunpack.i.h.bf16 %v3120_v25  ;;  %v3121_v42 = vunpack.i.l.bf16 %v3120_v25 }
  0xc9   : > { %2688 = vmatpush1.bf16.msra.mxu0 %v2687_v29  ;;  %v2724_v48 = vpack.c.bf16 %v483_v27, %v482_v28 }
  0xca   : > { %2691 = vmatprep.subr.msk.bf16.mxu0 %vm3958_vm13, %v2689_v40  ;;  %v493_v20 = vsel %vm481_vm9, %v3122_v41, %v3127_v19  ;;  %v492_v21 = vsel %vm481_vm9, %v3121_v42, %v3126_v30 }
  0xcb   : > { %2720 = vmatpush1.bf16.msra.mxu1 %v2719_v31  ;;  %v3135_v15 = vpop.permute.xlu1 %3134  ;;  %v3130_v47 = vpop.permute.xlu0 %3129  ;;  %v2698_v3 = vpack.c.bf16 %v493_v20, %v492_v21 }
  0xcc   : > { %v3137_v29 = vunpack.i.h.bf16 %v3135_v15  ;;  %v3136_v45 = vunpack.i.l.bf16 %v3135_v15  ;;  %2723 = vmatprep.subr.msk.bf16.mxu1 %vm3978_vm15, %v2721_v26  ;;  %v3132_v53 = vunpack.i.h.bf16 %v3130_v47  ;;  %v3131_v54 = vunpack.i.l.bf16 %v3130_v47 }
  0xcd   : > { %2694 = vmatpush1.bf16.msk.msra.mxu0 %vm3985_vm1, %v2692_v14 }
  0xce   : > { %v496_v31 = vsel %vm481_vm9, %v3136_v45, %v3121_v42  ;;  %v497_v55 = vsel %vm481_vm9, %v3137_v29, %v3122_v41  ;;  %v485_v57 = vsel %vm481_vm9, %v3132_v53, %v3137_v29  ;;  %v489_v58 = vsel %vm481_vm9, %v3127_v19, %v3132_v53 }
  0xcf   : > { %v2727_v56 = vpack.c.bf16 %v497_v55, %v496_v31  ;;  %v484_v59 = vsel %vm481_vm9, %v3131_v54, %v3136_v45  ;;  %2726 = vmatpush1.bf16.msk.msra.mxu1 %vm3999_vm2, %v2724_v48  ;;  %v488_v60 = vsel %vm481_vm9, %v3126_v30, %v3131_v54 }
  0xd0   : > { %v2730_v61 = vpack.c.bf16 %v485_v57, %v484_v59  ;;  %v2695_v63 = vpack.c.bf16 %v489_v58, %v488_v60 }
  0xd1   : > { %2729 = vmatprep.subr.msk.bf16.mxu1 %vm3978_vm15, %v2727_v56 }
  0xd2   : > { %2697 = vmatprep.subr.msk.bf16.mxu0 %vm3958_vm13, %v2695_v63 }
  0xd3   : > { %2732 = vmatpush1.bf16.msk.msra.mxu1 %vm3999_vm2, %v2730_v61  ;;  %2700 = vmatpush1.bf16.msk.msra.mxu0 %vm3985_vm1, %v2698_v3 }
  0xd6   : > { %2472 = vmatmul.mubr.msk.f32.vlgmr.msra.gmra.mrb[0].mxu1 %vm534_vm3, %v376_v7  ;;  %2452 = vmatmul.mubr.msk.f32.vlgmr.msra.gmra.mrb[0].mxu0 %vm534_vm3, %v376_v7 }
  0xd7   : > { %706 = vmatprep.mubr.f32.mxu1 %v3564_v32  ;;  %617 = vmatprep.mubr.f32.mxu0 %v3564_v32 }
  0xda   : > { %2473 = vmatmul.mubr.msk.f32.gmra.mrb[2].mxu1 %vm534_vm3, %v377_v10  ;;  %2453 = vmatmul.mubr.msk.f32.gmra.mrb[2].mxu0 %vm534_vm3, %v377_v10 }
  0xdb   : > { %712 = vmatprep.mubr.f32.mxu1 %v3564_v32  ;;  %623 = vmatprep.mubr.f32.mxu0 %v3564_v32 }
  0xdc   : > { %v517_v35 = vpop.permute.xlu0 %516  ;;  %v522_v38 = vpop.permute.xlu1 %521 }
  0xde   : > { %2474 = vmatmul.mubr.msk.f32.gmra.mrb[4].mxu1 %vm534_vm3, %v378_v11  ;;  %2454 = vmatmul.mubr.msk.f32.gmra.mrb[4].mxu0 %vm534_vm3, %v378_v11  ;;  %v729_v11 = vld [vmem:[%s4886_s4] sm:$0xff] }
  0xdf   : > { %718 = vmatprep.mubr.f32.mxu1 %v3564_v32  ;;  %629 = vmatprep.mubr.f32.mxu0 %v3564_v32 }
  0xe0   : > { %v527_v14 = vpop.permute.xlu1 %526  ;;  %v532_v15 = vpop.permute.xlu0 %531 }
  0xe2   : > { %2475 = vmatmul.mubr.msk.f32.gmra.mrb[6].mxu1 %vm534_vm3, %v379_v17  ;;  %2455 = vmatmul.mubr.msk.f32.gmra.mrb[6].mxu0 %vm534_vm3, %v379_v17  ;;  %v730_v17 = vld [vmem:[%s4886_s4 + $0x8] sm:$0xff] }
  0xe3   : > { %1046 = vmatprep.mubr.f32.mxu1 %v3564_v32  ;;  %957 = vmatprep.mubr.f32.mxu0 %v3564_v32 }
 0x1a9   : > { %v702_v22 = vpop.f32.mrb[0].mxu1  ;;  %v613_v34 = vpop.f32.mrb[0].mxu0 }
 0x1aa   : > { %v704_v24 = vpop.f32.mrb[1].mxu1  ;;  %v615_v37 = vpop.f32.mrb[1].mxu0  ;;  %v4059_v33 = vadd.f32 %v702_v22, %v517_v35  ;;  %v4065_v9 = vadd.f32 %v613_v34, %v517_v35  ;;  %v731_v22 = vld [vmem:[%s4886_s4 + $0x10] sm:$0xff]  ;;  %v732_v34 = vld [vmem:[%s4886_s4 + $0x18] sm:$0xff] }
 0x1ab   : > { %v4061_v43 = vadd.f32 %v704_v24, %v517_v35  ;;  %v4067_v23 = vadd.f32 %v615_v37, %v517_v35 }
 0x1ad   : > { %v708_v46 = vpop.f32.mrb[2].mxu1  ;;  %v619_v51 = vpop.f32.mrb[2].mxu0 }
 0x1ae   : > { %v4063_v49 = vadd.f32 %v708_v46, %v522_v38  ;;  %v710_v8 = vpop.f32.mrb[3].mxu1  ;;  %v4069_v5 = vadd.f32 %v619_v51, %v522_v38  ;;  %v621_v2 = vpop.f32.mrb[3].mxu0 }
 0x1af   : > { %v4071_v4 = vadd.f32 %v710_v8, %v522_v38  ;;  %v4075_v12 = vadd.f32 %v621_v2, %v522_v38 }
 0x1b0   : > { %v2779_v6 = vpack.c.bf16 %v4063_v49, %v4059_v33  ;;  %v3145_v13 = vpack.i.bf16 %v4063_v49, %v4059_v33  ;;  %v2747_v25 = vpack.c.bf16 %v4069_v5, %v4065_v9  ;;  %v3140_v26 = vpack.i.bf16 %v4069_v5, %v4065_v9 }
 0x1b1   : > { %v714_v1 = vpop.f32.mrb[4].mxu1  ;;  %v3155_v27 = vpack.i.bf16 %v4071_v4, %v4061_v43  ;;  %v625_v28 = vpop.f32.mrb[4].mxu0  ;;  %v3150_v19 = vpack.i.bf16 %v4075_v12, %v4067_v23  ;;  %v2745_v41 = vpack.c.bf16 %v4075_v12, %v4067_v23  ;;  %v2777_v42 = vpack.c.bf16 %v4071_v4, %v4061_v43 }
 0x1b2   : > { %v716_v40 = vpop.f32.mrb[5].mxu1  ;;  %v627_v30 = vpop.f32.mrb[5].mxu0  ;;  %3141 = vrot.lane.b32.xlu1 %v3140_v26, %s3562_s12  ;;  %v4093_v45 = vadd.f32 %v625_v28, %v527_v14  ;;  %v4095_v47 = vadd.f32 %v714_v1, %v527_v14 }
 0x1b3   : > { %3151 = vrot.lane.b32.xlu0 %v3150_v19, %s3562_s12  ;;  %v4099_v20 = vadd.f32 %v627_v30, %v527_v14  ;;  %v4101_v21 = vadd.f32 %v716_v40, %v527_v14 }
 0x1b5   : > { %v720_v29 = vpop.f32.mrb[6].mxu1  ;;  %v631_v48 = vpop.f32.mrb[6].mxu0 }
 0x1b6   : > { %v4097_v53 = vadd.f32 %v720_v29, %v532_v15  ;;  %v722_v54 = vpop.f32.mrb[7].mxu1  ;;  %v4103_v31 = vadd.f32 %v631_v48, %v532_v15  ;;  %v633_v55 = vpop.f32.mrb[7].mxu0  ;;  %3146 = vrot.lane.b32.xlu1 %v3145_v13, %s3562_s12 }
 0x1b7   : > { %v4105_v56 = vadd.f32 %v722_v54, %v532_v15  ;;  %v4110_v58 = vadd.f32 %v633_v55, %v532_v15  ;;  %3156 = vrot.lane.b32.xlu0 %v3155_v27, %s3562_s12 }
 0x1b8   : > { %v2783_v57 = vpack.c.bf16 %v4097_v53, %v4095_v47  ;;  %v3165_v59 = vpack.i.bf16 %v4097_v53, %v4095_v47  ;;  %v2751_v60 = vpack.c.bf16 %v4103_v31, %v4093_v45  ;;  %v3160_v61 = vpack.i.bf16 %v4103_v31, %v4093_v45 }
 0x1b9   : > { %v3180_v63 = vpack.i.bf16 %v4105_v56, %v4101_v21  ;;  %v3175_v3 = vpack.i.bf16 %v4110_v58, %v4099_v20  ;;  %v2749_v7 = vpack.c.bf16 %v4110_v58, %v4099_v20  ;;  %v2781_v10 = vpack.c.bf16 %v4105_v56, %v4101_v21 }
 0x1ba   : > { %3161 = vrot.lane.b32.xlu1 %v3160_v61, %s3562_s12 }
 0x1bb   : > { %3176 = vrot.lane.b32.xlu0 %v3175_v3, %s3562_s12 }
 0x1be   : > { %3166 = vrot.lane.b32.xlu1 %v3165_v59, %s3562_s12 }
 0x1bf   : > { %3181 = vrot.lane.b32.xlu0 %v3180_v63, %s3562_s12 }
 0x1c2   : > { %3171 = vrot.lane.b32.xlu1 %v3140_v26, %s3563_s20 }
 0x1c3   : > { %3186 = vrot.lane.b32.xlu0 %v3150_v19, %s3563_s20 }
 0x1c6   : > { %3191 = vrot.lane.b32.xlu1 %v3145_v13, %s3563_s20 }
 0x1c7   : > { %3196 = vrot.lane.b32.xlu0 %v3155_v27, %s3563_s20 }
 0x1ca   : > { %3201 = vrot.lane.b32.xlu1 %v3160_v61, %s3563_s20 }
 0x1cb   : > { %3211 = vrot.lane.b32.xlu0 %v3175_v3, %s3563_s20 }
 0x1ce   : > { %3206 = vrot.lane.b32.xlu1 %v3165_v59, %s3563_s20 }
 0x1cf   : > { %3216 = vrot.lane.b32.xlu0 %v3180_v63, %s3563_s20 }
 0x1d2   : > { %863 = vperm.xlu1 %3139, %v729_v11  }
 0x1d3   : > { %868 = vperm.xlu0 %3138, %v730_v17  }
 0x1d6   : > { %873 = vperm.xlu1 %3139, %v731_v22  }
 0x1d7   : > { %878 = vperm.xlu0 %3138, %v732_v34  }
 0x224   : > { %v3142_v24 = vpop.permute.xlu1 %3141 }
 0x225   : > { %v3144_v35 = vunpack.i.h.bf16 %v3142_v24  ;;  %v3143_v37 = vunpack.i.l.bf16 %v3142_v24  ;;  %v3152_v38 = vpop.permute.xlu0 %3151 }
 0x226   : > { %v3154_v46 = vunpack.i.h.bf16 %v3152_v38  ;;  %v3153_v51 = vunpack.i.l.bf16 %v3152_v38 }
 0x228   : > { %v773_v8 = vsel %vm416_vm0, %v3143_v37, %v3153_v51  ;;  %v774_v2 = vsel %vm416_vm0, %v3144_v35, %v3154_v46  ;;  %v3147_v13 = vpop.permute.xlu1 %3146 }
 0x229   : > { %v2733_v1 = vpack.c.bf16 %v774_v2, %v773_v8  ;;  %v3149_v26 = vunpack.i.h.bf16 %v3147_v13  ;;  %v3148_v27 = vunpack.i.l.bf16 %v3147_v13  ;;  %v3157_v28 = vpop.permute.xlu0 %3156 }
 0x22a   : > { %v3159_v40 = vunpack.i.h.bf16 %v3157_v28  ;;  %v3158_v19 = vunpack.i.l.bf16 %v3157_v28 }
 0x22b   : > { %v770_v30 = vsel %vm416_vm0, %v3154_v46, %v3149_v26  ;;  %v769_v14 = vsel %vm416_vm0, %v3153_v51, %v3148_v27  ;;  %2735 = vmatprep.subr.msk.bf16.mxu0 %vm3864_vm6, %v2733_v1 }
 0x22c   : > { %v765_v15 = vsel %vm416_vm0, %v3148_v27, %v3158_v19  ;;  %v766_v29 = vsel %vm416_vm0, %v3149_v26, %v3159_v40  ;;  %v777_v48 = vsel %vm416_vm0, %v3158_v19, %v3143_v37  ;;  %v3162_v54 = vpop.permute.xlu1 %3161  ;;  %v778_v55 = vsel %vm416_vm0, %v3159_v40, %v3144_v35 }
 0x22d   : > { %v2765_v59 = vpack.c.bf16 %v766_v29, %v765_v15  ;;  %v3164_v61 = vunpack.i.h.bf16 %v3162_v54  ;;  %v3163_v63 = vunpack.i.l.bf16 %v3162_v54  ;;  %v3177_v3 = vpop.permute.xlu0 %3176  ;;  %v2768_v11 = vpack.c.bf16 %v770_v30, %v769_v14 }
 0x22e   : > { %v2736_v17 = vpack.c.bf16 %v778_v55, %v777_v48  ;;  %v3179_v22 = vunpack.i.h.bf16 %v3177_v3  ;;  %v3178_v34 = vunpack.i.l.bf16 %v3177_v3 }
 0x22f   : > { %2767 = vmatprep.subr.msk.bf16.mxu1 %vm3849_vm5, %v2765_v59 }
 0x230   : > { %v775_v24 = vsel %vm416_vm0, %v3163_v63, %v3178_v34  ;;  %v776_v37 = vsel %vm416_vm0, %v3164_v61, %v3179_v22  ;;  %2738 = vmatpush1.bf16.msk.msra.mxu0 %vm3871_vm7, %v2736_v17  ;;  %v3167_v35 = vpop.permute.xlu1 %3166  ;;  %2770 = vmatpush1.bf16.msk.msra.mxu1 %vm3884_vm8, %v2768_v11 }
 0x231   : > { %v2739_v38 = vpack.c.bf16 %v776_v37, %v775_v24  ;;  %v3169_v46 = vunpack.i.h.bf16 %v3167_v35  ;;  %v3168_v51 = vunpack.i.l.bf16 %v3167_v35  ;;  %v3182_v8 = vpop.permute.xlu0 %3181 }
 0x232   : > { %v3184_v2 = vunpack.i.h.bf16 %v3182_v8  ;;  %v3183_v13 = vunpack.i.l.bf16 %v3182_v8 }
 0x233   : > { %v772_v1 = vsel %vm416_vm0, %v3179_v22, %v3169_v46  ;;  %v771_v26 = vsel %vm416_vm0, %v3178_v34, %v3168_v51  ;;  %2741 = vmatprep.subr.msk.bf16.mxu0 %vm3864_vm6, %v2739_v38 }
 0x234   : > { %v767_v27 = vsel %vm416_vm0, %v3168_v51, %v3183_v13  ;;  %v768_v28 = vsel %vm416_vm0, %v3169_v46, %v3184_v2  ;;  %v779_v40 = vsel %vm416_vm0, %v3183_v13, %v3163_v63  ;;  %v3172_v19 = vpop.permute.xlu1 %3171  ;;  %v780_v30 = vsel %vm416_vm0, %v3184_v2, %v3164_v61 }
 0x235   : > { %v2771_v14 = vpack.c.bf16 %v768_v28, %v767_v27  ;;  %v3187_v15 = vpop.permute.xlu0 %3186  ;;  %v2774_v29 = vpack.c.bf16 %v772_v1, %v771_v26  ;;  %v2742_v48 = vpack.c.bf16 %v780_v30, %v779_v40  ;;  %v3173_v54 = vunpack.i.l.bf16 %v3172_v19  ;;  %v725_v28 = vld [vmem:[%s4885_s3] sm:$0xff]  ;;  %v726_v40 = vld [vmem:[%s4885_s3 + $0x8] sm:$0xff]  ;;  %v728_v30 = vld [vmem:[%s4885_s3 + $0x18] sm:$0xff] }
 0x236   : > { %v3189_v59 = vunpack.i.h.bf16 %v3187_v15  ;;  %v3188_v63 = vunpack.i.l.bf16 %v3187_v15  ;;  %v3174_v17 = vunpack.i.h.bf16 %v3172_v19  ;;  %v727_v19 = vld [vmem:[%s4885_s3 + $0x10] sm:$0xff] }
 0x237   : > { %2773 = vmatprep.subr.msk.bf16.mxu1 %vm3849_vm5, %v2771_v14  ;;  %2744 = vmatpush1.bf16.msk.msra.mxu0 %vm3871_vm7, %v2742_v48 }
 0x238   : > { %v3192_v55 = vpop.permute.xlu1 %3191  ;;  %2776 = vmatpush1.bf16.msk.msra.mxu1 %vm3884_vm8, %v2774_v29  ;;  %2746 = vmatprep.subr.bf16.mxu0 %v2745_v41  ;;  %v837_v12 = vsel %vm481_vm9, %v3173_v54, %v3188_v63  ;;  %v838_v5 = vsel %vm481_vm9, %v3174_v17, %v3189_v59 }
 0x239   : > { %v3194_v3 = vunpack.i.h.bf16 %v3192_v55  ;;  %v3193_v11 = vunpack.i.l.bf16 %v3192_v55  ;;  %v3197_v61 = vpop.permute.xlu0 %3196  ;;  %2778 = vmatprep.subr.bf16.mxu1 %v2777_v42  ;;  %v2756_v56 = vpack.c.bf16 %v838_v5, %v837_v12 }
 0x23a   : > { %v3199_v22 = vunpack.i.h.bf16 %v3197_v61  ;;  %v3198_v34 = vunpack.i.l.bf16 %v3197_v61 }
 0x23b   : > { %v834_v24 = vsel %vm481_vm9, %v3189_v59, %v3194_v3  ;;  %v833_v37 = vsel %vm481_vm9, %v3188_v63, %v3193_v11  ;;  %2748 = vmatpush1.bf16.msra.mxu0 %v2747_v25 }
 0x23c   : > { %v3202_v23 = vpop.permute.xlu1 %3201  ;;  %v841_v43 = vsel %vm481_vm9, %v3198_v34, %v3173_v54  ;;  %v842_v4 = vsel %vm481_vm9, %v3199_v22, %v3174_v17  ;;  %2750 = vmatprep.subr.bf16.mxu0 %v2749_v7  ;;  %2780 = vmatpush1.bf16.msra.mxu1 %v2779_v6  ;;  %v2753_v25 = vpack.c.bf16 %v834_v24, %v833_v37 }
 0x23d   : > { %v3212_v9 = vpop.permute.xlu0 %3211  ;;  %v829_v41 = vsel %vm481_vm9, %v3193_v11, %v3198_v34  ;;  %v830_v42 = vsel %vm481_vm9, %v3194_v3, %v3199_v22  ;;  %2782 = vmatprep.subr.bf16.mxu1 %v2781_v10  ;;  %v3204_v20 = vunpack.i.h.bf16 %v3202_v23  ;;  %v3203_v58 = vunpack.i.l.bf16 %v3202_v23 }
 0x23e   : > { %v3214_v7 = vunpack.i.h.bf16 %v3212_v9  ;;  %v3213_v33 = vunpack.i.l.bf16 %v3212_v9  ;;  %v2785_v49 = vpack.c.bf16 %v842_v4, %v841_v43  ;;  %v2788_v10 = vpack.c.bf16 %v830_v42, %v829_v41 }
 0x23f   : > { %2752 = vmatpush1.bf16.msra.mxu0 %v2751_v60 }
 0x240   : > { %v3207_v6 = vpop.permute.xlu1 %3206  ;;  %2755 = vmatprep.subr.msk.bf16.mxu0 %vm3958_vm13, %v2753_v25  ;;  %2784 = vmatpush1.bf16.msra.mxu1 %v2783_v57  ;;  %v839_v45 = vsel %vm481_vm9, %v3203_v58, %v3213_v33  ;;  %v840_v31 = vsel %vm481_vm9, %v3204_v20, %v3214_v7 }
 0x241   : > { %v3209_v35 = vunpack.i.h.bf16 %v3207_v6  ;;  %v3208_v38 = vunpack.i.l.bf16 %v3207_v6  ;;  %v3217_v21 = vpop.permute.xlu0 %3216  ;;  %2787 = vmatprep.subr.msk.bf16.mxu1 %vm3978_vm15, %v2785_v49  ;;  %v2762_v26 = vpack.c.bf16 %v840_v31, %v839_v45 }
 0x242   : > { %v3219_v46 = vunpack.i.h.bf16 %v3217_v21  ;;  %v3218_v51 = vunpack.i.l.bf16 %v3217_v21 }
 0x243   : > { %v836_v60 = vsel %vm481_vm9, %v3214_v7, %v3209_v35  ;;  %v835_v47 = vsel %vm481_vm9, %v3213_v33, %v3208_v38  ;;  %2758 = vmatpush1.bf16.msk.msra.mxu0 %vm3985_vm1, %v2756_v56 }
 0x244   : > { %v2759_v53 = vpack.c.bf16 %v836_v60, %v835_v47  ;;  %v831_v57 = vsel %vm481_vm9, %v3208_v38, %v3218_v51  ;;  %v832_v8 = vsel %vm481_vm9, %v3209_v35, %v3219_v46  ;;  %v843_v2 = vsel %vm481_vm9, %v3218_v51, %v3203_v58  ;;  %2790 = vmatpush1.bf16.msk.msra.mxu1 %vm3999_vm2, %v2788_v10 }
 0x245   : > { %v844_v13 = vsel %vm481_vm9, %v3219_v46, %v3204_v20  ;;  %v2794_v1 = vpack.c.bf16 %v832_v8, %v831_v57 }
 0x246   : > { %v2791_v27 = vpack.c.bf16 %v844_v13, %v843_v2  ;;  %2761 = vmatprep.subr.msk.bf16.mxu0 %vm3958_vm13, %v2759_v53 }
 0x247   : > { %2764 = vmatpush1.bf16.msk.msra.mxu0 %vm3985_vm1, %v2762_v26 }
 0x248   : > { %2793 = vmatprep.subr.msk.bf16.mxu1 %vm3978_vm15, %v2791_v27 }
 0x249   : > { %2796 = vmatpush1.bf16.msk.msra.mxu1 %vm3999_vm2, %v2794_v1 }
 0x24a   : > { %2492 = vmatmul.mubr.msk.f32.vlgmr.msra.gmra.mrb[8].mxu0 %vm534_vm3, %v725_v28 }
 0x24b   : > { %963 = vmatprep.mubr.f32.mxu0 %v3564_v32 }
 0x24c   : > { %2512 = vmatmul.mubr.msk.f32.vlgmr.msra.gmra.mrb[8].mxu1 %vm534_vm3, %v725_v28 }
 0x24d   : > { %1052 = vmatprep.mubr.f32.mxu1 %v3564_v32 }
 0x24e   : > { %2493 = vmatmul.mubr.msk.f32.gmra.mrb[10].mxu0 %vm534_vm3, %v726_v40 }
 0x24f   : > { %969 = vmatprep.mubr.f32.mxu0 %v3564_v32 }
 0x250   : > { %2513 = vmatmul.mubr.msk.f32.gmra.mrb[10].mxu1 %vm534_vm3, %v726_v40 }
 0x251   : > { %1058 = vmatprep.mubr.f32.mxu1 %v3564_v32  ;;  %v864_v48 = vpop.permute.xlu1 %863 }
 0x252   : > { %2494 = vmatmul.mubr.msk.f32.gmra.mrb[12].mxu0 %vm534_vm3, %v727_v19  ;;  %v869_v59 = vpop.permute.xlu0 %868 }
 0x253   : > { %975 = vmatprep.mubr.f32.mxu0 %v3564_v32 }
 0x254   : > { %2514 = vmatmul.mubr.msk.f32.gmra.mrb[12].mxu1 %vm534_vm3, %v727_v19 }
 0x255   : > { %1064 = vmatprep.mubr.f32.mxu1 %v3564_v32  ;;  %v874_v35 = vpop.permute.xlu1 %873 }
 0x256   : > { %2495 = vmatmul.mubr.msk.f32.gmra.mrb[14].mxu0 %vm534_vm3, %v728_v30  ;;  %v879_v31 = vpop.permute.xlu0 %878 }
 0x257   : > { %1321 = vmatprep.mubr.f32.mxu0 %v3564_v32 }
 0x258   : > { %2515 = vmatmul.mubr.msk.f32.gmra.mrb[14].mxu1 %vm534_vm3, %v728_v30 }
 0x259   : > { %1410 = vmatprep.mubr.f32.mxu1 %v3564_v32 }
 0x31d   : > { %v959_v14 = vpop.f32.mrb[8].mxu0 }
 0x31e   : > { %v961_v15 = vpop.f32.mrb[9].mxu0  ;;  %v960_v55 = vadd.f32 %v959_v14, %v864_v48 }
 0x31f   : > { %v1048_v29 = vpop.f32.mrb[8].mxu1  ;;  %v962_v63 = vadd.f32 %v961_v15, %v864_v48 }
 0x320   : > { %v1050_v54 = vpop.f32.mrb[9].mxu1  ;;  %v1049_v3 = vadd.f32 %v1048_v29, %v864_v48  ;;  %v1071_v12 = vmax.f32 %v960_v55, 0.0 }
 0x321   : > { %v965_v11 = vpop.f32.mrb[10].mxu0  ;;  %v1051_v61 = vadd.f32 %v1050_v54, %v864_v48  ;;  %v1072_v9 = vmax.f32 %v962_v63, 0.0 }
 0x322   : > { %v966_v17 = vadd.f32 %v965_v11, %v869_v59  ;;  %v967_v22 = vpop.f32.mrb[11].mxu0  ;;  %v1073_v5 = vmax.f32 %v1049_v3, 0.0 }
 0x323   : > { %v1054_v34 = vpop.f32.mrb[10].mxu1  ;;  %v968_v24 = vadd.f32 %v967_v22, %v869_v59  ;;  %v1074_v20 = vmax.f32 %v1051_v61, 0.0 }
 0x324   : > { %v1055_v37 = vadd.f32 %v1054_v34, %v869_v59  ;;  %v1056_v23 = vpop.f32.mrb[11].mxu1  ;;  %v1075_v43 = vmax.f32 %v966_v17, 0.0 }
 0x325   : > { %v1057_v4 = vadd.f32 %v1056_v23, %v869_v59  ;;  %v1076_v25 = vmax.f32 %v968_v24, 0.0  ;;  %v971_v42 = vpop.f32.mrb[12].mxu0  ;;  %v2520_v24 = vld [vmem:[%s4886_s4 + $0x20] sm:$0xff]  ;;  %v2522_v23 = vld [vmem:[%s4886_s4 + $0x30] sm:$0xff] }
 0x326   : > { %v1077_v41 = vmax.f32 %v1055_v37, 0.0  ;;  %v4299_v58 = vpack.c.bf16 %v1075_v43, %v1071_v12  ;;  %v973_v33 = vpop.f32.mrb[13].mxu0  ;;  %v3220_v6 = vpack.i.bf16 %v1075_v43, %v1071_v12  ;;  %v972_v10 = vadd.f32 %v971_v42, %v874_v35  ;;  %v2521_v37 = vld [vmem:[%s4886_s4 + $0x28] sm:$0xff]  ;;  %v2523_v12 = vld [vmem:[%s4886_s4 + $0x38] sm:$0xff] }
 0x327   : > { %v1078_v7 = vmax.f32 %v1057_v4, 0.0  ;;  %v1060_v49 = vpop.f32.mrb[12].mxu1  ;;  %v3230_v56 = vpack.i.bf16 %v1076_v25, %v1072_v9  ;;  %v974_v46 = vadd.f32 %v973_v33, %v874_v35  ;;  %v4305_v27 = vpack.c.bf16 %v1076_v25, %v1072_v9 }
 0x328   : > { %v4301_v38 = vpack.c.bf16 %v1077_v41, %v1073_v5  ;;  %v1062_v21 = vpop.f32.mrb[13].mxu1  ;;  %3221 = vrot.lane.b32.xlu1 %v3220_v6, %s3562_s12  ;;  %v3225_v51 = vpack.i.bf16 %v1077_v41, %v1073_v5  ;;  %v1061_v60 = vadd.f32 %v1060_v49, %v874_v35  ;;  %v1079_v40 = vmax.f32 %v972_v10, 0.0 }
 0x329   : > { %v3235_v45 = vpack.i.bf16 %v1078_v7, %v1074_v20  ;;  %v1063_v47 = vadd.f32 %v1062_v21, %v874_v35  ;;  %v977_v53 = vpop.f32.mrb[14].mxu0  ;;  %3231 = vrot.lane.b32.xlu0 %v3230_v56, %s3562_s12  ;;  %v4307_v28 = vpack.c.bf16 %v1078_v7, %v1074_v20  ;;  %v1080_v19 = vmax.f32 %v974_v46, 0.0 }
 0x32a   : > { %v978_v57 = vadd.f32 %v977_v53, %v879_v31  ;;  %v979_v8 = vpop.f32.mrb[15].mxu0  ;;  %v1081_v15 = vmax.f32 %v1061_v60, 0.0 }
 0x32b   : > { %v1066_v2 = vpop.f32.mrb[14].mxu1  ;;  %v980_v13 = vadd.f32 %v979_v8, %v879_v31  ;;  %v1082_v29 = vmax.f32 %v1063_v47, 0.0 }
 0x32c   : > { %v1067_v1 = vadd.f32 %v1066_v2, %v879_v31  ;;  %v1068_v26 = vpop.f32.mrb[15].mxu1  ;;  %v1083_v30 = vmax.f32 %v978_v57, 0.0  ;;  %3226 = vrot.lane.b32.xlu1 %v3225_v51, %s3562_s12 }
 0x32d   : > { %v1069_v14 = vadd.f32 %v1068_v26, %v879_v31  ;;  %v1084_v48 = vmax.f32 %v980_v13, 0.0  ;;  %3236 = vrot.lane.b32.xlu0 %v3235_v45, %s3562_s12 }
 0x32e   : > { %v1085_v54 = vmax.f32 %v1067_v1, 0.0  ;;  %v4311_v55 = vpack.c.bf16 %v1083_v30, %v1079_v40  ;;  %v3240_v63 = vpack.i.bf16 %v1083_v30, %v1079_v40 }
 0x32f   : > { %v1086_v59 = vmax.f32 %v1069_v14, 0.0  ;;  %v3255_v11 = vpack.i.bf16 %v1084_v48, %v1080_v19  ;;  %v4316_v22 = vpack.c.bf16 %v1084_v48, %v1080_v19 }
 0x330   : > { %v4313_v3 = vpack.c.bf16 %v1085_v54, %v1081_v15  ;;  %v3245_v61 = vpack.i.bf16 %v1085_v54, %v1081_v15  ;;  %3241 = vrot.lane.b32.xlu1 %v3240_v63, %s3562_s12 }
 0x331   : > { %v3260_v17 = vpack.i.bf16 %v1086_v59, %v1082_v29  ;;  %3256 = vrot.lane.b32.xlu0 %v3255_v11, %s3562_s12  ;;  %v4319_v34 = vpack.c.bf16 %v1086_v59, %v1082_v29 }
 0x334   : > { %3246 = vrot.lane.b32.xlu1 %v3245_v61, %s3562_s12 }
 0x335   : > { %3261 = vrot.lane.b32.xlu0 %v3260_v17, %s3562_s12 }
 0x338   : > { %3251 = vrot.lane.b32.xlu1 %v3220_v6, %s3563_s20 }
 0x339   : > { %3266 = vrot.lane.b32.xlu0 %v3230_v56, %s3563_s20 }
 0x33c   : > { %3271 = vrot.lane.b32.xlu1 %v3225_v51, %s3563_s20 }
 0x33d   : > { %3276 = vrot.lane.b32.xlu0 %v3235_v45, %s3563_s20 }
 0x340   : > { %3281 = vrot.lane.b32.xlu1 %v3240_v63, %s3563_s20 }
 0x341   : > { %3291 = vrot.lane.b32.xlu0 %v3255_v11, %s3563_s20 }
 0x344   : > { %3286 = vrot.lane.b32.xlu1 %v3245_v61, %s3563_s20 }
 0x345   : > { %3296 = vrot.lane.b32.xlu0 %v3260_v17, %s3563_s20 }
 0x348   : > { %1227 = vperm.xlu1 %3139, %v2520_v24  }
 0x349   : > { %1232 = vperm.xlu0 %3138, %v2521_v37  }
 0x34c   : > { %1237 = vperm.xlu1 %3139, %v2522_v23  }
 0x34d   : > { %1242 = vperm.xlu0 %3138, %v2523_v12  }
 0x39a   : > { %v3222_v43 = vpop.permute.xlu1 %3221 }
 0x39b   : > { %v3224_v4 = vunpack.i.h.bf16 %v3222_v43  ;;  %v3223_v9 = vunpack.i.l.bf16 %v3222_v43  ;;  %v3232_v5 = vpop.permute.xlu0 %3231 }
 0x39c   : > { %v3234_v25 = vunpack.i.h.bf16 %v3232_v5  ;;  %v3233_v41 = vunpack.i.l.bf16 %v3232_v5 }
 0x39e   : > { %v1137_v42 = vsel %vm416_vm0, %v3223_v9, %v3233_v41  ;;  %v1138_v20 = vsel %vm416_vm0, %v3224_v4, %v3234_v25  ;;  %v3227_v7 = vpop.permute.xlu1 %3226 }
 0x39f   : > { %v2797_v33 = vpack.c.bf16 %v1138_v20, %v1137_v42  ;;  %v3229_v49 = vunpack.i.h.bf16 %v3227_v7  ;;  %v3228_v6 = vunpack.i.l.bf16 %v3227_v7  ;;  %v3237_v35 = vpop.permute.xlu0 %3236 }
 0x3a0   : > { %v3239_v21 = vunpack.i.h.bf16 %v3237_v35  ;;  %v3238_v56 = vunpack.i.l.bf16 %v3237_v35 }
 0x3a1   : > { %v1134_v10 = vsel %vm416_vm0, %v3234_v25, %v3229_v49  ;;  %v1133_v46 = vsel %vm416_vm0, %v3233_v41, %v3228_v6  ;;  %2799 = vmatprep.subr.msk.bf16.mxu0 %vm3864_vm6, %v2797_v33 }
 0x3a2   : > { %v1129_v51 = vsel %vm416_vm0, %v3228_v6, %v3238_v56  ;;  %v1130_v45 = vsel %vm416_vm0, %v3229_v49, %v3239_v21  ;;  %v1141_v31 = vsel %vm416_vm0, %v3238_v56, %v3223_v9  ;;  %v3242_v60 = vpop.permute.xlu1 %3241  ;;  %v1142_v47 = vsel %vm416_vm0, %v3239_v21, %v3224_v4 }
 0x3a3   : > { %v2829_v53 = vpack.c.bf16 %v1130_v45, %v1129_v51  ;;  %v3244_v57 = vunpack.i.h.bf16 %v3242_v60  ;;  %v3243_v8 = vunpack.i.l.bf16 %v3242_v60  ;;  %v3257_v2 = vpop.permute.xlu0 %3256  ;;  %v2832_v13 = vpack.c.bf16 %v1134_v10, %v1133_v46 }
 0x3a4   : > { %v2800_v1 = vpack.c.bf16 %v1142_v47, %v1141_v31  ;;  %v3259_v26 = vunpack.i.h.bf16 %v3257_v2  ;;  %v3258_v40 = vunpack.i.l.bf16 %v3257_v2 }
 0x3a5   : > { %2831 = vmatprep.subr.msk.bf16.mxu1 %vm3849_vm5, %v2829_v53 }
 0x3a6   : > { %v1139_v19 = vsel %vm416_vm0, %v3243_v8, %v3258_v40  ;;  %v1140_v30 = vsel %vm416_vm0, %v3244_v57, %v3259_v26  ;;  %2802 = vmatpush1.bf16.msk.msra.mxu0 %vm3871_vm7, %v2800_v1  ;;  %v3247_v14 = vpop.permute.xlu1 %3246  ;;  %2834 = vmatpush1.bf16.msk.msra.mxu1 %vm3884_vm8, %v2832_v13 }
 0x3a7   : > { %v2803_v15 = vpack.c.bf16 %v1140_v30, %v1139_v19  ;;  %v3249_v29 = vunpack.i.h.bf16 %v3247_v14  ;;  %v3248_v48 = vunpack.i.l.bf16 %v3247_v14  ;;  %v3262_v54 = vpop.permute.xlu0 %3261 }
 0x3a8   : > { %v3264_v59 = vunpack.i.h.bf16 %v3262_v54  ;;  %v3263_v63 = vunpack.i.l.bf16 %v3262_v54 }
 0x3a9   : > { %v1136_v11 = vsel %vm416_vm0, %v3259_v26, %v3249_v29  ;;  %v1135_v61 = vsel %vm416_vm0, %v3258_v40, %v3248_v48  ;;  %2805 = vmatprep.subr.msk.bf16.mxu0 %vm3864_vm6, %v2803_v15 }
 0x3aa   : > { %v1131_v17 = vsel %vm416_vm0, %v3248_v48, %v3263_v63  ;;  %v1132_v24 = vsel %vm416_vm0, %v3249_v29, %v3264_v59  ;;  %v1143_v37 = vsel %vm416_vm0, %v3263_v63, %v3243_v8  ;;  %v3252_v23 = vpop.permute.xlu1 %3251  ;;  %v1144_v12 = vsel %vm416_vm0, %v3264_v59, %v3244_v57 }
 0x3ab   : > { %v2835_v43 = vpack.c.bf16 %v1132_v24, %v1131_v17  ;;  %v3267_v4 = vpop.permute.xlu0 %3266  ;;  %v2838_v9 = vpack.c.bf16 %v1136_v11, %v1135_v61  ;;  %v2806_v5 = vpack.c.bf16 %v1144_v12, %v1143_v37  ;;  %v3253_v25 = vunpack.i.l.bf16 %v3252_v23  ;;  %v2516_v24 = vld [vmem:[%s4885_s3 + $0x20] sm:$0xff]  ;;  %v2517_v37 = vld [vmem:[%s4885_s3 + $0x28] sm:$0xff]  ;;  %v2519_v12 = vld [vmem:[%s4885_s3 + $0x38] sm:$0xff] }
 0x3ac   : > { %v3269_v42 = vunpack.i.h.bf16 %v3267_v4  ;;  %v3268_v20 = vunpack.i.l.bf16 %v3267_v4  ;;  %v3254_v6 = vunpack.i.h.bf16 %v3252_v23  ;;  %v2518_v23 = vld [vmem:[%s4885_s3 + $0x30] sm:$0xff] }
 0x3ad   : > { %2837 = vmatprep.subr.msk.bf16.mxu1 %vm3849_vm5, %v2835_v43  ;;  %2808 = vmatpush1.bf16.msk.msra.mxu0 %vm3871_vm7, %v2806_v5 }
 0x3ae   : > { %v3272_v41 = vpop.permute.xlu1 %3271  ;;  %2840 = vmatpush1.bf16.msk.msra.mxu1 %vm3884_vm8, %v2838_v9  ;;  %2810 = vmatprep.subr.bf16.mxu0 %v4305_v27  ;;  %v1201_v51 = vsel %vm481_vm9, %v3253_v25, %v3268_v20  ;;  %v1202_v31 = vsel %vm481_vm9, %v3254_v6, %v3269_v42 }
 0x3af   : > { %v3274_v7 = vunpack.i.h.bf16 %v3272_v41  ;;  %v3273_v33 = vunpack.i.l.bf16 %v3272_v41  ;;  %v3277_v49 = vpop.permute.xlu0 %3276  ;;  %2842 = vmatprep.subr.bf16.mxu1 %v4307_v28  ;;  %v2820_v40 = vpack.c.bf16 %v1202_v31, %v1201_v51 }
 0x3b0   : > { %v3279_v35 = vunpack.i.h.bf16 %v3277_v49  ;;  %v3278_v21 = vunpack.i.l.bf16 %v3277_v49 }
 0x3b1   : > { %v1198_v56 = vsel %vm481_vm9, %v3269_v42, %v3274_v7  ;;  %v1197_v10 = vsel %vm481_vm9, %v3268_v20, %v3273_v33  ;;  %2812 = vmatpush1.bf16.msra.mxu0 %v4299_v58 }
 0x3b2   : > { %v3282_v46 = vpop.permute.xlu1 %3281  ;;  %v1205_v27 = vsel %vm481_vm9, %v3278_v21, %v3253_v25  ;;  %v1206_v28 = vsel %vm481_vm9, %v3279_v35, %v3254_v6  ;;  %2814 = vmatprep.subr.bf16.mxu0 %v4316_v22  ;;  %2844 = vmatpush1.bf16.msra.mxu1 %v4301_v38  ;;  %v2817_v60 = vpack.c.bf16 %v1198_v56, %v1197_v10 }
 0x3b3   : > { %v3292_v45 = vpop.permute.xlu0 %3291  ;;  %v1193_v58 = vsel %vm481_vm9, %v3273_v33, %v3278_v21  ;;  %v1194_v47 = vsel %vm481_vm9, %v3274_v7, %v3279_v35  ;;  %2846 = vmatprep.subr.bf16.mxu1 %v4319_v34  ;;  %v3284_v53 = vunpack.i.h.bf16 %v3282_v46  ;;  %v3283_v57 = vunpack.i.l.bf16 %v3282_v46 }
 0x3b4   : > { %v3294_v8 = vunpack.i.h.bf16 %v3292_v45  ;;  %v3293_v2 = vunpack.i.l.bf16 %v3292_v45  ;;  %v2849_v22 = vpack.c.bf16 %v1206_v28, %v1205_v27  ;;  %v2852_v19 = vpack.c.bf16 %v1194_v47, %v1193_v58 }
 0x3b5   : > { %2816 = vmatpush1.bf16.msra.mxu0 %v4311_v55 }
 0x3b6   : > { %v3287_v38 = vpop.permute.xlu1 %3286  ;;  %2819 = vmatprep.subr.msk.bf16.mxu0 %vm3958_vm13, %v2817_v60  ;;  %2848 = vmatpush1.bf16.msra.mxu1 %v4313_v3  ;;  %v1203_v14 = vsel %vm481_vm9, %v3283_v57, %v3293_v2  ;;  %v1204_v55 = vsel %vm481_vm9, %v3284_v53, %v3294_v8 }
 0x3b7   : > { %v3289_v13 = vunpack.i.h.bf16 %v3287_v38  ;;  %v3288_v1 = vunpack.i.l.bf16 %v3287_v38  ;;  %v3297_v26 = vpop.permute.xlu0 %3296  ;;  %2851 = vmatprep.subr.msk.bf16.mxu1 %vm3978_vm15, %v2849_v22  ;;  %v2826_v61 = vpack.c.bf16 %v1204_v55, %v1203_v14 }
 0x3b8   : > { %v3299_v30 = vunpack.i.h.bf16 %v3297_v26  ;;  %v3298_v34 = vunpack.i.l.bf16 %v3297_v26 }
 0x3b9   : > { %v1200_v15 = vsel %vm481_vm9, %v3294_v8, %v3289_v13  ;;  %v1199_v3 = vsel %vm481_vm9, %v3293_v2, %v3288_v1  ;;  %2822 = vmatpush1.bf16.msk.msra.mxu0 %vm3985_vm1, %v2820_v40 }
 0x3ba   : > { %v2823_v29 = vpack.c.bf16 %v1200_v15, %v1199_v3  ;;  %v1195_v48 = vsel %vm481_vm9, %v3288_v1, %v3298_v34  ;;  %v1196_v54 = vsel %vm481_vm9, %v3289_v13, %v3299_v30  ;;  %v1207_v59 = vsel %vm481_vm9, %v3298_v34, %v3283_v57  ;;  %2854 = vmatpush1.bf16.msk.msra.mxu1 %vm3999_vm2, %v2852_v19 }
 0x3bb   : > { %v1208_v63 = vsel %vm481_vm9, %v3299_v30, %v3284_v53  ;;  %v2858_v11 = vpack.c.bf16 %v1196_v54, %v1195_v48 }
 0x3bc   : > { %v2855_v17 = vpack.c.bf16 %v1208_v63, %v1207_v59  ;;  %2825 = vmatprep.subr.msk.bf16.mxu0 %vm3958_vm13, %v2823_v29 }
 0x3bd   : > { %2828 = vmatpush1.bf16.msk.msra.mxu0 %vm3985_vm1, %v2826_v61 }
 0x3be   : > { %2857 = vmatprep.subr.msk.bf16.mxu1 %vm3978_vm15, %v2855_v17 }
 0x3bf   : > { %2860 = vmatpush1.bf16.msk.msra.mxu1 %vm3999_vm2, %v2858_v11 }
 0x3c0   : > { %2540 = vmatmul.mubr.msk.f32.vlgmr.msra.gmra.mrb[16].mxu0 %vm534_vm3, %v2516_v24 }
 0x3c1   : > { %1327 = vmatprep.mubr.f32.mxu0 %v3564_v32 }
 0x3c2   : > { %2560 = vmatmul.mubr.msk.f32.vlgmr.msra.gmra.mrb[16].mxu1 %vm534_vm3, %v2516_v24 }
 0x3c3   : > { %1416 = vmatprep.mubr.f32.mxu1 %v3564_v32 }
 0x3c4   : > { %2541 = vmatmul.mubr.msk.f32.gmra.mrb[18].mxu0 %vm534_vm3, %v2517_v37 }
 0x3c5   : > { %1333 = vmatprep.mubr.f32.mxu0 %v3564_v32 }
 0x3c6   : > { %2561 = vmatmul.mubr.msk.f32.gmra.mrb[18].mxu1 %vm534_vm3, %v2517_v37 }
 0x3c7   : > { %1422 = vmatprep.mubr.f32.mxu1 %v3564_v32  ;;  %v1228_v5 = vpop.permute.xlu1 %1227 }
 0x3c8   : > { %2542 = vmatmul.mubr.msk.f32.gmra.mrb[20].mxu0 %vm534_vm3, %v2518_v23  ;;  %v1233_v42 = vpop.permute.xlu0 %1232 }
 0x3c9   : > { %1339 = vmatprep.mubr.f32.mxu0 %v3564_v32 }
 0x3ca   : > { %2562 = vmatmul.mubr.msk.f32.gmra.mrb[20].mxu1 %vm534_vm3, %v2518_v23 }
 0x3cb   : > { %1428 = vmatprep.mubr.f32.mxu1 %v3564_v32  ;;  %v1238_v13 = vpop.permute.xlu1 %1237 }
 0x3cc   : > { %2543 = vmatmul.mubr.msk.f32.gmra.mrb[22].mxu0 %vm534_vm3, %v2519_v12  ;;  %v1243_v55 = vpop.permute.xlu0 %1242 }
 0x3cd   : > { %1685 = vmatprep.mubr.f32.mxu0 %v3564_v32 }
 0x3ce   : > { %2563 = vmatmul.mubr.msk.f32.gmra.mrb[22].mxu1 %vm534_vm3, %v2519_v12 }
 0x3cf   : > { %1774 = vmatprep.mubr.f32.mxu1 %v3564_v32 }
 0x493   : > { %v1323_v43 = vpop.f32.mrb[16].mxu0 }
 0x494   : > { %v1325_v4 = vpop.f32.mrb[17].mxu0  ;;  %v1324_v41 = vadd.f32 %v1323_v43, %v1228_v5 }
 0x495   : > { %v1412_v9 = vpop.f32.mrb[16].mxu1  ;;  %v1326_v20 = vadd.f32 %v1325_v4, %v1228_v5 }
 0x496   : > { %v1414_v25 = vpop.f32.mrb[17].mxu1  ;;  %v1413_v7 = vadd.f32 %v1412_v9, %v1228_v5  ;;  %v1435_v51 = vmax.f32 %v1324_v41, 0.0 }
 0x497   : > { %v1329_v33 = vpop.f32.mrb[18].mxu0  ;;  %v1415_v49 = vadd.f32 %v1414_v25, %v1228_v5  ;;  %v1436_v45 = vmax.f32 %v1326_v20, 0.0 }
 0x498   : > { %v1330_v6 = vadd.f32 %v1329_v33, %v1233_v42  ;;  %v1331_v35 = vpop.f32.mrb[19].mxu0  ;;  %v1437_v31 = vmax.f32 %v1413_v7, 0.0 }
 0x499   : > { %v1418_v21 = vpop.f32.mrb[18].mxu1  ;;  %v1332_v56 = vadd.f32 %v1331_v35, %v1233_v42  ;;  %v1438_v53 = vmax.f32 %v1415_v49, 0.0 }
 0x49a   : > { %v1419_v10 = vadd.f32 %v1418_v21, %v1233_v42  ;;  %v1420_v46 = vpop.f32.mrb[19].mxu1  ;;  %v1439_v27 = vmax.f32 %v1330_v6, 0.0 }
 0x49b   : > { %v1421_v28 = vadd.f32 %v1420_v46, %v1233_v42  ;;  %v1440_v60 = vmax.f32 %v1332_v56, 0.0  ;;  %v1335_v47 = vpop.f32.mrb[20].mxu0  ;;  %v2568_v56 = vld [vmem:[%s4886_s4 + $0x40] sm:$0xff]  ;;  %v2570_v46 = vld [vmem:[%s4886_s4 + $0x50] sm:$0xff] }
 0x49c   : > { %v1441_v58 = vmax.f32 %v1419_v10, 0.0  ;;  %v4475_v57 = vpack.c.bf16 %v1439_v27, %v1435_v51  ;;  %v1337_v2 = vpop.f32.mrb[21].mxu0  ;;  %v3300_v38 = vpack.i.bf16 %v1439_v27, %v1435_v51  ;;  %v1336_v19 = vadd.f32 %v1335_v47, %v1238_v13  ;;  %v2569_v10 = vld [vmem:[%s4886_s4 + $0x48] sm:$0xff]  ;;  %v2571_v51 = vld [vmem:[%s4886_s4 + $0x58] sm:$0xff] }
 0x49d   : > { %v1442_v8 = vmax.f32 %v1421_v28, 0.0  ;;  %v1424_v22 = vpop.f32.mrb[20].mxu1  ;;  %v3310_v40 = vpack.i.bf16 %v1440_v60, %v1436_v45  ;;  %v1338_v30 = vadd.f32 %v1337_v2, %v1238_v13  ;;  %v4481_v17 = vpack.c.bf16 %v1440_v60, %v1436_v45 }
 0x49e   : > { %v4477_v1 = vpack.c.bf16 %v1441_v58, %v1437_v31  ;;  %v1426_v26 = vpop.f32.mrb[21].mxu1  ;;  %3301 = vrot.lane.b32.xlu1 %v3300_v38, %s3562_s12  ;;  %v3305_v34 = vpack.i.bf16 %v1441_v58, %v1437_v31  ;;  %v1425_v15 = vadd.f32 %v1424_v22, %v1238_v13  ;;  %v1443_v37 = vmax.f32 %v1336_v19, 0.0 }
 0x49f   : > { %v3315_v14 = vpack.i.bf16 %v1442_v8, %v1438_v53  ;;  %v1427_v3 = vadd.f32 %v1426_v26, %v1238_v13  ;;  %v1341_v29 = vpop.f32.mrb[22].mxu0  ;;  %3311 = vrot.lane.b32.xlu0 %v3310_v40, %s3562_s12  ;;  %v4483_v24 = vpack.c.bf16 %v1442_v8, %v1438_v53  ;;  %v1444_v23 = vmax.f32 %v1338_v30, 0.0 }
 0x4a0   : > { %v1342_v48 = vadd.f32 %v1341_v29, %v1243_v55  ;;  %v1343_v54 = vpop.f32.mrb[23].mxu0  ;;  %v1445_v4 = vmax.f32 %v1425_v15, 0.0 }
 0x4a1   : > { %v1430_v59 = vpop.f32.mrb[22].mxu1  ;;  %v1344_v63 = vadd.f32 %v1343_v54, %v1243_v55  ;;  %v1446_v9 = vmax.f32 %v1427_v3, 0.0 }
 0x4a2   : > { %v1431_v11 = vadd.f32 %v1430_v59, %v1243_v55  ;;  %v1432_v61 = vpop.f32.mrb[23].mxu1  ;;  %v1447_v12 = vmax.f32 %v1342_v48, 0.0  ;;  %3306 = vrot.lane.b32.xlu1 %v3305_v34, %s3562_s12 }
 0x4a3   : > { %v1433_v43 = vadd.f32 %v1432_v61, %v1243_v55  ;;  %v1448_v5 = vmax.f32 %v1344_v63, 0.0  ;;  %3316 = vrot.lane.b32.xlu0 %v3315_v14, %s3562_s12 }
 0x4a4   : > { %v1449_v25 = vmax.f32 %v1431_v11, 0.0  ;;  %v4487_v41 = vpack.c.bf16 %v1447_v12, %v1443_v37  ;;  %v3320_v20 = vpack.i.bf16 %v1447_v12, %v1443_v37 }
 0x4a5   : > { %v1450_v42 = vmax.f32 %v1433_v43, 0.0  ;;  %v3335_v33 = vpack.i.bf16 %v1448_v5, %v1444_v23  ;;  %v4492_v35 = vpack.c.bf16 %v1448_v5, %v1444_v23 }
 0x4a6   : > { %v4489_v7 = vpack.c.bf16 %v1449_v25, %v1445_v4  ;;  %v3325_v49 = vpack.i.bf16 %v1449_v25, %v1445_v4  ;;  %3321 = vrot.lane.b32.xlu1 %v3320_v20, %s3562_s12 }
 0x4a7   : > { %v3340_v6 = vpack.i.bf16 %v1450_v42, %v1446_v9  ;;  %3336 = vrot.lane.b32.xlu0 %v3335_v33, %s3562_s12  ;;  %v4495_v21 = vpack.c.bf16 %v1450_v42, %v1446_v9 }
 0x4aa   : > { %3326 = vrot.lane.b32.xlu1 %v3325_v49, %s3562_s12 }
 0x4ab   : > { %3341 = vrot.lane.b32.xlu0 %v3340_v6, %s3562_s12 }
 0x4ae   : > { %3331 = vrot.lane.b32.xlu1 %v3300_v38, %s3563_s20 }
 0x4af   : > { %3346 = vrot.lane.b32.xlu0 %v3310_v40, %s3563_s20 }
 0x4b2   : > { %3351 = vrot.lane.b32.xlu1 %v3305_v34, %s3563_s20 }
 0x4b3   : > { %3356 = vrot.lane.b32.xlu0 %v3315_v14, %s3563_s20 }
 0x4b6   : > { %3361 = vrot.lane.b32.xlu1 %v3320_v20, %s3563_s20 }
 0x4b7   : > { %3371 = vrot.lane.b32.xlu0 %v3335_v33, %s3563_s20 }
 0x4ba   : > { %3366 = vrot.lane.b32.xlu1 %v3325_v49, %s3563_s20 }
 0x4bb   : > { %3376 = vrot.lane.b32.xlu0 %v3340_v6, %s3563_s20 }
 0x4be   : > { %1591 = vperm.xlu1 %3139, %v2568_v56  }
 0x4bf   : > { %1596 = vperm.xlu0 %3138, %v2569_v10  }
 0x4c2   : > { %1601 = vperm.xlu1 %3139, %v2570_v46  }
 0x4c3   : > { %1606 = vperm.xlu0 %3138, %v2571_v51  }
 0x510   : > { %v3302_v27 = vpop.permute.xlu1 %3301 }
 0x511   : > { %v3304_v28 = vunpack.i.h.bf16 %v3302_v27  ;;  %v3303_v45 = vunpack.i.l.bf16 %v3302_v27  ;;  %v3312_v31 = vpop.permute.xlu0 %3311 }
 0x512   : > { %v3314_v60 = vunpack.i.h.bf16 %v3312_v31  ;;  %v3313_v58 = vunpack.i.l.bf16 %v3312_v31 }
 0x514   : > { %v1501_v47 = vsel %vm416_vm0, %v3303_v45, %v3313_v58  ;;  %v1502_v53 = vsel %vm416_vm0, %v3304_v28, %v3314_v60  ;;  %v3307_v8 = vpop.permute.xlu1 %3306 }
 0x515   : > { %v2861_v2 = vpack.c.bf16 %v1502_v53, %v1501_v47  ;;  %v3309_v22 = vunpack.i.h.bf16 %v3307_v8  ;;  %v3308_v38 = vunpack.i.l.bf16 %v3307_v8  ;;  %v3317_v13 = vpop.permute.xlu0 %3316 }
 0x516   : > { %v3319_v26 = vunpack.i.h.bf16 %v3317_v13  ;;  %v3318_v40 = vunpack.i.l.bf16 %v3317_v13 }
 0x517   : > { %v1498_v19 = vsel %vm416_vm0, %v3314_v60, %v3309_v22  ;;  %v1497_v30 = vsel %vm416_vm0, %v3313_v58, %v3308_v38  ;;  %2863 = vmatprep.subr.msk.bf16.mxu0 %vm3864_vm6, %v2861_v2 }
 0x518   : > { %v1493_v34 = vsel %vm416_vm0, %v3308_v38, %v3318_v40  ;;  %v1494_v14 = vsel %vm416_vm0, %v3309_v22, %v3319_v26  ;;  %v1505_v55 = vsel %vm416_vm0, %v3318_v40, %v3303_v45  ;;  %v3322_v15 = vpop.permute.xlu1 %3321  ;;  %v1506_v3 = vsel %vm416_vm0, %v3319_v26, %v3304_v28 }
 0x519   : > { %v2893_v29 = vpack.c.bf16 %v1494_v14, %v1493_v34  ;;  %v3324_v48 = vunpack.i.h.bf16 %v3322_v15  ;;  %v3323_v54 = vunpack.i.l.bf16 %v3322_v15  ;;  %v3337_v59 = vpop.permute.xlu0 %3336  ;;  %v2896_v63 = vpack.c.bf16 %v1498_v19, %v1497_v30 }
 0x51a   : > { %v2864_v11 = vpack.c.bf16 %v1506_v3, %v1505_v55  ;;  %v3339_v61 = vunpack.i.h.bf16 %v3337_v59  ;;  %v3338_v37 = vunpack.i.l.bf16 %v3337_v59 }
 0x51b   : > { %2895 = vmatprep.subr.msk.bf16.mxu1 %vm3849_vm5, %v2893_v29 }
 0x51c   : > { %v1503_v23 = vsel %vm416_vm0, %v3323_v54, %v3338_v37  ;;  %v1504_v12 = vsel %vm416_vm0, %v3324_v48, %v3339_v61  ;;  %2866 = vmatpush1.bf16.msk.msra.mxu0 %vm3871_vm7, %v2864_v11  ;;  %v3327_v43 = vpop.permute.xlu1 %3326  ;;  %2898 = vmatpush1.bf16.msk.msra.mxu1 %vm3884_vm8, %v2896_v63 }
 0x51d   : > { %v2867_v4 = vpack.c.bf16 %v1504_v12, %v1503_v23  ;;  %v3329_v9 = vunpack.i.h.bf16 %v3327_v43  ;;  %v3328_v5 = vunpack.i.l.bf16 %v3327_v43  ;;  %v3342_v25 = vpop.permute.xlu0 %3341 }
 0x51e   : > { %v3344_v42 = vunpack.i.h.bf16 %v3342_v25  ;;  %v3343_v20 = vunpack.i.l.bf16 %v3342_v25 }
 0x51f   : > { %v1500_v33 = vsel %vm416_vm0, %v3339_v61, %v3329_v9  ;;  %v1499_v49 = vsel %vm416_vm0, %v3338_v37, %v3328_v5  ;;  %2869 = vmatprep.subr.msk.bf16.mxu0 %vm3864_vm6, %v2867_v4 }
 0x520   : > { %v1495_v6 = vsel %vm416_vm0, %v3328_v5, %v3343_v20  ;;  %v1496_v56 = vsel %vm416_vm0, %v3329_v9, %v3344_v42  ;;  %v1507_v10 = vsel %vm416_vm0, %v3343_v20, %v3323_v54  ;;  %v3332_v46 = vpop.permute.xlu1 %3331  ;;  %v1508_v51 = vsel %vm416_vm0, %v3344_v42, %v3324_v48 }
 0x521   : > { %v2899_v27 = vpack.c.bf16 %v1496_v56, %v1495_v6  ;;  %v3347_v28 = vpop.permute.xlu0 %3346  ;;  %v2902_v45 = vpack.c.bf16 %v1500_v33, %v1499_v49  ;;  %v2870_v31 = vpack.c.bf16 %v1508_v51, %v1507_v10  ;;  %v3333_v60 = vunpack.i.l.bf16 %v3332_v46  ;;  %v2564_v56 = vld [vmem:[%s4885_s3 + $0x40] sm:$0xff]  ;;  %v2565_v10 = vld [vmem:[%s4885_s3 + $0x48] sm:$0xff]  ;;  %v2567_v51 = vld [vmem:[%s4885_s3 + $0x58] sm:$0xff] }
 0x522   : > { %v3349_v47 = vunpack.i.h.bf16 %v3347_v28  ;;  %v3348_v53 = vunpack.i.l.bf16 %v3347_v28  ;;  %v3334_v38 = vunpack.i.h.bf16 %v3332_v46  ;;  %v2566_v46 = vld [vmem:[%s4885_s3 + $0x50] sm:$0xff] }
 0x523   : > { %2901 = vmatprep.subr.msk.bf16.mxu1 %vm3849_vm5, %v2899_v27  ;;  %2872 = vmatpush1.bf16.msk.msra.mxu0 %vm3871_vm7, %v2870_v31 }
 0x524   : > { %v3352_v58 = vpop.permute.xlu1 %3351  ;;  %2904 = vmatpush1.bf16.msk.msra.mxu1 %vm3884_vm8, %v2902_v45  ;;  %2874 = vmatprep.subr.bf16.mxu0 %v4481_v17  ;;  %v1565_v34 = vsel %vm481_vm9, %v3333_v60, %v3348_v53  ;;  %v1566_v55 = vsel %vm481_vm9, %v3334_v38, %v3349_v47 }
 0x525   : > { %v3354_v8 = vunpack.i.h.bf16 %v3352_v58  ;;  %v3353_v2 = vunpack.i.l.bf16 %v3352_v58  ;;  %v3357_v22 = vpop.permute.xlu0 %3356  ;;  %2906 = vmatprep.subr.bf16.mxu1 %v4483_v24  ;;  %v2884_v37 = vpack.c.bf16 %v1566_v55, %v1565_v34 }
 0x526   : > { %v3359_v13 = vunpack.i.h.bf16 %v3357_v22  ;;  %v3358_v26 = vunpack.i.l.bf16 %v3357_v22 }
 0x527   : > { %v1562_v40 = vsel %vm481_vm9, %v3349_v47, %v3354_v8  ;;  %v1561_v19 = vsel %vm481_vm9, %v3348_v53, %v3353_v2  ;;  %2876 = vmatpush1.bf16.msra.mxu0 %v4475_v57 }
 0x528   : > { %v3362_v30 = vpop.permute.xlu1 %3361  ;;  %v1569_v17 = vsel %vm481_vm9, %v3358_v26, %v3333_v60  ;;  %v1570_v24 = vsel %vm481_vm9, %v3359_v13, %v3334_v38  ;;  %2878 = vmatprep.subr.bf16.mxu0 %v4492_v35  ;;  %2908 = vmatpush1.bf16.msra.mxu1 %v4477_v1  ;;  %v2881_v15 = vpack.c.bf16 %v1562_v40, %v1561_v19 }
 0x529   : > { %v3372_v14 = vpop.permute.xlu0 %3371  ;;  %v1557_v57 = vsel %vm481_vm9, %v3353_v2, %v3358_v26  ;;  %v1558_v3 = vsel %vm481_vm9, %v3354_v8, %v3359_v13  ;;  %2910 = vmatprep.subr.bf16.mxu1 %v4495_v21  ;;  %v3364_v29 = vunpack.i.h.bf16 %v3362_v30  ;;  %v3363_v48 = vunpack.i.l.bf16 %v3362_v30 }
 0x52a   : > { %v3374_v54 = vunpack.i.h.bf16 %v3372_v14  ;;  %v3373_v59 = vunpack.i.l.bf16 %v3372_v14  ;;  %v2913_v35 = vpack.c.bf16 %v1570_v24, %v1569_v17  ;;  %v2916_v23 = vpack.c.bf16 %v1558_v3, %v1557_v57 }
 0x52b   : > { %2880 = vmatpush1.bf16.msra.mxu0 %v4487_v41 }
 0x52c   : > { %v3367_v1 = vpop.permute.xlu1 %3366  ;;  %2883 = vmatprep.subr.msk.bf16.mxu0 %vm3958_vm13, %v2881_v15  ;;  %2912 = vmatpush1.bf16.msra.mxu1 %v4489_v7  ;;  %v1567_v43 = vsel %vm481_vm9, %v3363_v48, %v3373_v59  ;;  %v1568_v41 = vsel %vm481_vm9, %v3364_v29, %v3374_v54 }
 0x52d   : > { %v3369_v63 = vunpack.i.h.bf16 %v3367_v1  ;;  %v3368_v11 = vunpack.i.l.bf16 %v3367_v1  ;;  %v3377_v61 = vpop.permute.xlu0 %3376  ;;  %2915 = vmatprep.subr.msk.bf16.mxu1 %vm3978_vm15, %v2913_v35  ;;  %v2890_v49 = vpack.c.bf16 %v1568_v41, %v1567_v43 }
 0x52e   : > { %v3379_v12 = vunpack.i.h.bf16 %v3377_v61  ;;  %v3378_v21 = vunpack.i.l.bf16 %v3377_v61 }
 0x52f   : > { %v1564_v4 = vsel %vm481_vm9, %v3374_v54, %v3369_v63  ;;  %v1563_v7 = vsel %vm481_vm9, %v3373_v59, %v3368_v11  ;;  %2886 = vmatpush1.bf16.msk.msra.mxu0 %vm3985_vm1, %v2884_v37 }
 0x530   : > { %v2887_v9 = vpack.c.bf16 %v1564_v4, %v1563_v7  ;;  %v1559_v5 = vsel %vm481_vm9, %v3368_v11, %v3378_v21  ;;  %v1560_v25 = vsel %vm481_vm9, %v3369_v63, %v3379_v12  ;;  %v1571_v42 = vsel %vm481_vm9, %v3378_v21, %v3363_v48  ;;  %2918 = vmatpush1.bf16.msk.msra.mxu1 %vm3999_vm2, %v2916_v23 }
 0x531   : > { %v1572_v20 = vsel %vm481_vm9, %v3379_v12, %v3364_v29  ;;  %v2922_v33 = vpack.c.bf16 %v1560_v25, %v1559_v5 }
 0x532   : > { %v2919_v6 = vpack.c.bf16 %v1572_v20, %v1571_v42  ;;  %2889 = vmatprep.subr.msk.bf16.mxu0 %vm3958_vm13, %v2887_v9 }
 0x533   : > { %2892 = vmatpush1.bf16.msk.msra.mxu0 %vm3985_vm1, %v2890_v49 }
 0x534   : > { %2921 = vmatprep.subr.msk.bf16.mxu1 %vm3978_vm15, %v2919_v6 }
 0x535   : > { %2924 = vmatpush1.bf16.msk.msra.mxu1 %vm3999_vm2, %v2922_v33 }
 0x536   : > { %2588 = vmatmul.mubr.msk.f32.vlgmr.msra.gmra.mrb[24].mxu0 %vm534_vm3, %v2564_v56 }
 0x537   : > { %1691 = vmatprep.mubr.f32.mxu0 %v3564_v32 }
 0x538   : > { %2608 = vmatmul.mubr.msk.f32.vlgmr.msra.gmra.mrb[24].mxu1 %vm534_vm3, %v2564_v56 }
 0x539   : > { %1780 = vmatprep.mubr.f32.mxu1 %v3564_v32 }
 0x53a   : > { %2589 = vmatmul.mubr.msk.f32.gmra.mrb[26].mxu0 %vm534_vm3, %v2565_v10 }
 0x53b   : > { %1697 = vmatprep.mubr.f32.mxu0 %v3564_v32 }
 0x53c   : > { %2609 = vmatmul.mubr.msk.f32.gmra.mrb[26].mxu1 %vm534_vm3, %v2565_v10 }
 0x53d   : > { %1786 = vmatprep.mubr.f32.mxu1 %v3564_v32  ;;  %v1592_v31 = vpop.permute.xlu1 %1591 }
 0x53e   : > { %2590 = vmatmul.mubr.msk.f32.gmra.mrb[28].mxu0 %vm534_vm3, %v2566_v46  ;;  %v1597_v47 = vpop.permute.xlu0 %1596 }
 0x53f   : > { %1703 = vmatprep.mubr.f32.mxu0 %v3564_v32 }
 0x540   : > { %2610 = vmatmul.mubr.msk.f32.gmra.mrb[28].mxu1 %vm534_vm3, %v2566_v46 }
 0x541   : > { %1792 = vmatprep.mubr.f32.mxu1 %v3564_v32  ;;  %v1602_v63 = vpop.permute.xlu1 %1601 }
 0x542   : > { %2591 = vmatmul.mubr.msk.f32.gmra.mrb[30].mxu0 %vm534_vm3, %v2567_v51  ;;  %v1607_v41 = vpop.permute.xlu0 %1606 }
 0x543   : > { %2049 = vmatprep.mubr.f32.mxu0 %v3564_v32 }
 0x544   : > { %2611 = vmatmul.mubr.msk.f32.gmra.mrb[30].mxu1 %vm534_vm3, %v2567_v51 }
 0x545   : > { %2138 = vmatprep.mubr.f32.mxu1 %v3564_v32 }
 0x609   : > { %v1687_v27 = vpop.f32.mrb[24].mxu0 }
 0x60a   : > { %v1689_v28 = vpop.f32.mrb[25].mxu0  ;;  %v1688_v58 = vadd.f32 %v1687_v27, %v1592_v31 }
 0x60b   : > { %v1776_v45 = vpop.f32.mrb[24].mxu1  ;;  %v1690_v53 = vadd.f32 %v1689_v28, %v1592_v31 }
 0x60c   : > { %v1778_v60 = vpop.f32.mrb[25].mxu1  ;;  %v1777_v8 = vadd.f32 %v1776_v45, %v1592_v31  ;;  %v1799_v34 = vmax.f32 %v1688_v58, 0.0 }
 0x60d   : > { %v1693_v2 = vpop.f32.mrb[26].mxu0  ;;  %v1779_v22 = vadd.f32 %v1778_v60, %v1592_v31  ;;  %v1800_v14 = vmax.f32 %v1690_v53, 0.0 }
 0x60e   : > { %v1694_v38 = vadd.f32 %v1693_v2, %v1597_v47  ;;  %v1695_v13 = vpop.f32.mrb[27].mxu0  ;;  %v1801_v55 = vmax.f32 %v1777_v8, 0.0 }
 0x60f   : > { %v1782_v26 = vpop.f32.mrb[26].mxu1  ;;  %v1696_v40 = vadd.f32 %v1695_v13, %v1597_v47  ;;  %v1802_v29 = vmax.f32 %v1779_v22, 0.0 }
 0x610   : > { %v1783_v19 = vadd.f32 %v1782_v26, %v1597_v47  ;;  %v1784_v30 = vpop.f32.mrb[27].mxu1  ;;  %v1803_v17 = vmax.f32 %v1694_v38, 0.0 }
 0x611   : > { %v1785_v24 = vadd.f32 %v1784_v30, %v1597_v47  ;;  %v1804_v15 = vmax.f32 %v1696_v40, 0.0  ;;  %v1699_v3 = vpop.f32.mrb[28].mxu0  ;;  %v2616_v40 = vld [vmem:[%s4886_s4 + $0x60] sm:$0xff]  ;;  %v2618_v30 = vld [vmem:[%s4886_s4 + $0x70] sm:$0xff] }
 0x612   : > { %v1805_v57 = vmax.f32 %v1783_v19, 0.0  ;;  %v4651_v48 = vpack.c.bf16 %v1803_v17, %v1799_v34  ;;  %v1701_v59 = vpop.f32.mrb[29].mxu0  ;;  %v3380_v1 = vpack.i.bf16 %v1803_v17, %v1799_v34  ;;  %v1700_v23 = vadd.f32 %v1699_v3, %v1602_v63  ;;  %v2617_v19 = vld [vmem:[%s4886_s4 + $0x68] sm:$0xff]  ;;  %v2619_v34 = vld [vmem:[%s4886_s4 + $0x78] sm:$0xff]  ;;  %v2180_v17 = vld [vmem:[%s4888_s6] sm:$0x7] }
 0x613   : > { %v1806_v54 = vmax.f32 %v1785_v24, 0.0  ;;  %v1788_v35 = vpop.f32.mrb[28].mxu1  ;;  %v3390_v37 = vpack.i.bf16 %v1804_v15, %v1800_v14  ;;  %v1702_v12 = vadd.f32 %v1701_v59, %v1602_v63  ;;  %v4657_v6 = vpack.c.bf16 %v1804_v15, %v1800_v14 }
 0x614   : > { %v4653_v11 = vpack.c.bf16 %v1805_v57, %v1801_v55  ;;  %v1790_v61 = vpop.f32.mrb[29].mxu1  ;;  %3381 = vrot.lane.b32.xlu1 %v3380_v1, %s3562_s12  ;;  %v3385_v21 = vpack.i.bf16 %v1805_v57, %v1801_v55  ;;  %v1789_v4 = vadd.f32 %v1788_v35, %v1602_v63  ;;  %v1807_v10 = vmax.f32 %v1700_v23, 0.0 }
 0x615   : > { %v3395_v43 = vpack.i.bf16 %v1806_v54, %v1802_v29  ;;  %v1791_v7 = vadd.f32 %v1790_v61, %v1602_v63  ;;  %v1705_v9 = vpop.f32.mrb[30].mxu0  ;;  %3391 = vrot.lane.b32.xlu0 %v3390_v37, %s3562_s12  ;;  %v4659_v56 = vpack.c.bf16 %v1806_v54, %v1802_v29  ;;  %v1808_v46 = vmax.f32 %v1702_v12, 0.0 }
 0x616   : > { %v1706_v5 = vadd.f32 %v1705_v9, %v1607_v41  ;;  %v1707_v25 = vpop.f32.mrb[31].mxu0  ;;  %v1809_v28 = vmax.f32 %v1789_v4, 0.0 }
 0x617   : > { %v1794_v42 = vpop.f32.mrb[30].mxu1  ;;  %v1708_v20 = vadd.f32 %v1707_v25, %v1607_v41  ;;  %v1810_v45 = vmax.f32 %v1791_v7, 0.0 }
 0x618   : > { %v1795_v33 = vadd.f32 %v1794_v42, %v1607_v41  ;;  %v1796_v49 = vpop.f32.mrb[31].mxu1  ;;  %v1811_v51 = vmax.f32 %v1706_v5, 0.0  ;;  %3386 = vrot.lane.b32.xlu1 %v3385_v21, %s3562_s12 }
 0x619   : > { %v1797_v27 = vadd.f32 %v1796_v49, %v1607_v41  ;;  %v1812_v31 = vmax.f32 %v1708_v20, 0.0  ;;  %3396 = vrot.lane.b32.xlu0 %v3395_v43, %s3562_s12 }
 0x61a   : > { %v1813_v60 = vmax.f32 %v1795_v33, 0.0  ;;  %v4663_v58 = vpack.c.bf16 %v1811_v51, %v1807_v10  ;;  %v3400_v53 = vpack.i.bf16 %v1811_v51, %v1807_v10 }
 0x61b   : > { %v1814_v47 = vmax.f32 %v1797_v27, 0.0  ;;  %v3415_v2 = vpack.i.bf16 %v1812_v31, %v1808_v46  ;;  %v4668_v13 = vpack.c.bf16 %v1812_v31, %v1808_v46 }
 0x61c   : > { %v4665_v8 = vpack.c.bf16 %v1813_v60, %v1809_v28  ;;  %v3405_v22 = vpack.i.bf16 %v1813_v60, %v1809_v28  ;;  %3401 = vrot.lane.b32.xlu1 %v3400_v53, %s3562_s12 }
 0x61d   : > { %v3420_v38 = vpack.i.bf16 %v1814_v47, %v1810_v45  ;;  %3416 = vrot.lane.b32.xlu0 %v3415_v2, %s3562_s12  ;;  %v4671_v26 = vpack.c.bf16 %v1814_v47, %v1810_v45 }
 0x620   : > { %3406 = vrot.lane.b32.xlu1 %v3405_v22, %s3562_s12 }
 0x621   : > { %3421 = vrot.lane.b32.xlu0 %v3420_v38, %s3562_s12  ;;  %s3490_s12 = scalar_lea.vmem %s4840_s11, 256 }
 0x622   : > { %p3491_p6 = scmp.ne.s32.totalorder %s4840_s11, %s3490_s12 }
 0x624   : > { %3411 = vrot.lane.b32.xlu1 %v3380_v1, %s3563_s20  ;;  %p3492_p12 = pnand %p3491_p6, %p4921_p11 }
 0x625   : > { %3426 = vrot.lane.b32.xlu0 %v3390_v37, %s3563_s20 }
 0x626   : > { %p3493_p13 = pneg %p3492_p12 }
 0x628   : > { %3431 = vrot.lane.b32.xlu1 %v3385_v21, %s3563_s20 }
 0x629   : > { %3436 = vrot.lane.b32.xlu0 %v3395_v43, %s3563_s20 }
 0x62c   : > { %3441 = vrot.lane.b32.xlu1 %v3400_v53, %s3563_s20 }
 0x62d   : > { %3451 = vrot.lane.b32.xlu0 %v3415_v2, %s3563_s20 }
 0x630   : > { %3446 = vrot.lane.b32.xlu1 %v3405_v22, %s3563_s20 }
 0x631   : > { %3456 = vrot.lane.b32.xlu0 %v3420_v38, %s3563_s20  ;;  %s2668_s20 = sshll.u32 %s3628_s28, 8  ;;  %s3566_s28 = smov [#allocation5]  }
 0x632   : > { %s4838_s15 = scalar_lea.hbm %s4889_s7, %s2668_s20  ;;  %s3494_s22 = sshll.u32 %s3566_s28, 4  ;;  %s3495_s22 = int_to_ptr.vmem [resolvable:$false] %s3494_s22 }
 0x633   : > { %s3496_s23 = scalar_lea.vmem %s3495_s22, 512  ;;  %p3497_p4 = scmp.lt.s32.totalorder %s4840_s11, %s3495_s22 }
 0x634   : > { %1955 = vperm.xlu1 %3139, %v2616_v40   ;;  %p3498_p10 = scmp.lt.s32.totalorder %s3496_s23, %s3490_s12 }
 0x635   : > { %1960 = vperm.xlu0 %3138, %v2617_v19  }
 0x636   : > { %p3499_p1 = por %p3498_p10, %p3497_p4 }
 0x638   : > { %1965 = vperm.xlu1 %3139, %v2618_v30   ;;  %p3500_p3 = pnand %p3499_p1, %p3493_p13 }
 0x639   : > { %1970 = vperm.xlu0 %3138, %v2619_v34  }
 0x63c   : > { %2183 = vperm.xlu1 %3139, %v2180_v17  }
 0x686   : > { %v3382_v24 = vpop.permute.xlu1 %3381 }
 0x687   : > { %v3384_v14 = vunpack.i.h.bf16 %v3382_v24  ;;  %v3383_v55 = vunpack.i.l.bf16 %v3382_v24  ;;  %v3392_v15 = vpop.permute.xlu0 %3391 }
 0x688   : > { %v3394_v57 = vunpack.i.h.bf16 %v3392_v15  ;;  %v3393_v3 = vunpack.i.l.bf16 %v3392_v15 }
 0x68a   : > { %v1865_v29 = vsel %vm416_vm0, %v3383_v55, %v3393_v3  ;;  %v1866_v54 = vsel %vm416_vm0, %v3384_v14, %v3394_v57  ;;  %v3387_v59 = vpop.permute.xlu1 %3386 }
 0x68b   : > { %v2925_v35 = vpack.c.bf16 %v1866_v54, %v1865_v29  ;;  %v3389_v1 = vunpack.i.h.bf16 %v3387_v59  ;;  %v3388_v63 = vunpack.i.l.bf16 %v3387_v59  ;;  %v3397_v61 = vpop.permute.xlu0 %3396 }
 0x68c   : > { %v3399_v37 = vunpack.i.h.bf16 %v3397_v61  ;;  %v3398_v23 = vunpack.i.l.bf16 %v3397_v61 }
 0x68d   : > { %v1862_v12 = vsel %vm416_vm0, %v3394_v57, %v3389_v1  ;;  %v1861_v21 = vsel %vm416_vm0, %v3393_v3, %v3388_v63  ;;  %2927 = vmatprep.subr.msk.bf16.mxu0 %vm3864_vm6, %v2925_v35 }
 0x68e   : > { %v1857_v43 = vsel %vm416_vm0, %v3388_v63, %v3398_v23  ;;  %v1858_v41 = vsel %vm416_vm0, %v3389_v1, %v3399_v37  ;;  %v1869_v4 = vsel %vm416_vm0, %v3398_v23, %v3383_v55  ;;  %v3402_v7 = vpop.permute.xlu1 %3401  ;;  %v1870_v9 = vsel %vm416_vm0, %v3399_v37, %v3384_v14 }
 0x68f   : > { %v2957_v5 = vpack.c.bf16 %v1858_v41, %v1857_v43  ;;  %v3404_v25 = vunpack.i.h.bf16 %v3402_v7  ;;  %v3403_v42 = vunpack.i.l.bf16 %v3402_v7  ;;  %v3417_v20 = vpop.permute.xlu0 %3416  ;;  %v2960_v33 = vpack.c.bf16 %v1862_v12, %v1861_v21 }
 0x690   : > { %v2928_v49 = vpack.c.bf16 %v1870_v9, %v1869_v4  ;;  %v3419_v10 = vunpack.i.h.bf16 %v3417_v20  ;;  %v3418_v46 = vunpack.i.l.bf16 %v3417_v20 }
 0x691   : > { %2959 = vmatprep.subr.msk.bf16.mxu1 %vm3849_vm5, %v2957_v5 }
 0x692   : > { %v1867_v51 = vsel %vm416_vm0, %v3403_v42, %v3418_v46  ;;  %v1868_v27 = vsel %vm416_vm0, %v3404_v25, %v3419_v10  ;;  %2930 = vmatpush1.bf16.msk.msra.mxu0 %vm3871_vm7, %v2928_v49  ;;  %v3407_v28 = vpop.permute.xlu1 %3406  ;;  %2962 = vmatpush1.bf16.msk.msra.mxu1 %vm3884_vm8, %v2960_v33 }
 0x693   : > { %v2931_v45 = vpack.c.bf16 %v1868_v27, %v1867_v51  ;;  %v3409_v31 = vunpack.i.h.bf16 %v3407_v28  ;;  %v3408_v60 = vunpack.i.l.bf16 %v3407_v28  ;;  %v3422_v47 = vpop.permute.xlu0 %3421 }
 0x694   : > { %v3424_v53 = vunpack.i.h.bf16 %v3422_v47  ;;  %v3423_v2 = vunpack.i.l.bf16 %v3422_v47 }
 0x695   : > { %v1864_v22 = vsel %vm416_vm0, %v3419_v10, %v3409_v31  ;;  %v1863_v38 = vsel %vm416_vm0, %v3418_v46, %v3408_v60  ;;  %2933 = vmatprep.subr.msk.bf16.mxu0 %vm3864_vm6, %v2931_v45 }
 0x696   : > { %v1859_v40 = vsel %vm416_vm0, %v3408_v60, %v3423_v2  ;;  %v1860_v19 = vsel %vm416_vm0, %v3409_v31, %v3424_v53  ;;  %v1871_v30 = vsel %vm416_vm0, %v3423_v2, %v3403_v42  ;;  %v3412_v34 = vpop.permute.xlu1 %3411  ;;  %v1872_v17 = vsel %vm416_vm0, %v3424_v53, %v3404_v25 }
 0x697   : > { %v2963_v24 = vpack.c.bf16 %v1860_v19, %v1859_v40  ;;  %v3427_v14 = vpop.permute.xlu0 %3426  ;;  %v2966_v55 = vpack.c.bf16 %v1864_v22, %v1863_v38  ;;  %v2934_v15 = vpack.c.bf16 %v1872_v17, %v1871_v30  ;;  %v3413_v16 = vunpack.i.l.bf16 %v3412_v34 }
 0x698   : > { %v3429_v3 = vunpack.i.h.bf16 %v3427_v14  ;;  %v3428_v29 = vunpack.i.l.bf16 %v3427_v14  ;;  %v3414_v1 = vunpack.i.h.bf16 %v3412_v34  ;;  %vm2186_vm0 = vcmask 261120  }
 0x699   : > { %2965 = vmatprep.subr.msk.bf16.mxu1 %vm3849_vm5, %v2963_v24  ;;  %2936 = vmatpush1.bf16.msk.msra.mxu0 %vm3871_vm7, %v2934_v15 }
 0x69a   : > { %v3432_v57 = vpop.permute.xlu1 %3431  ;;  %2968 = vmatpush1.bf16.msk.msra.mxu1 %vm3884_vm8, %v2966_v55  ;;  %2938 = vmatprep.subr.bf16.mxu0 %v4657_v6  ;;  %v1929_v37 = vsel %vm481_vm9, %v3413_v16, %v3428_v29  ;;  %v1930_v12 = vsel %vm481_vm9, %v3414_v1, %v3429_v3 }
 0x69b   : > { %v3434_v54 = vunpack.i.h.bf16 %v3432_v57  ;;  %v3433_v59 = vunpack.i.l.bf16 %v3432_v57  ;;  %v3437_v35 = vpop.permute.xlu0 %3436  ;;  %2970 = vmatprep.subr.bf16.mxu1 %v4659_v56  ;;  %v2948_v20 = vpack.c.bf16 %v1930_v12, %v1929_v37 }
 0x69c   : > { %v3439_v62 = vunpack.i.h.bf16 %v3437_v35  ;;  %v3438_v63 = vunpack.i.l.bf16 %v3437_v35 }
 0x69d   : > { %v1926_v36 = vsel %vm481_vm9, %v3429_v3, %v3434_v54  ;;  %v1925_v61 = vsel %vm481_vm9, %v3428_v29, %v3433_v59  ;;  %2940 = vmatpush1.bf16.msra.mxu0 %v4651_v48 }
 0x69e   : > { %v3442_v50 = vpop.permute.xlu1 %3441  ;;  %v1933_v6 = vsel %vm481_vm9, %v3438_v63, %v3413_v16  ;;  %v1934_v56 = vsel %vm481_vm9, %v3439_v62, %v3414_v1  ;;  %2942 = vmatprep.subr.bf16.mxu0 %v4668_v13  ;;  %2972 = vmatpush1.bf16.msra.mxu1 %v4653_v11  ;;  %v2945_v21 = vpack.c.bf16 %v1926_v36, %v1925_v61 }
 0x69f   : > { %v3452_v23 = vpop.permute.xlu0 %3451  ;;  %v1921_v48 = vsel %vm481_vm9, %v3433_v59, %v3438_v63  ;;  %v1922_v43 = vsel %vm481_vm9, %v3434_v54, %v3439_v62  ;;  %2974 = vmatprep.subr.bf16.mxu1 %v4671_v26  ;;  %v3444_v41 = vunpack.i.h.bf16 %v3442_v50  ;;  %v3443_v4 = vunpack.i.l.bf16 %v3442_v50 }
 0x6a0   : > { %v3454_v7 = vunpack.i.h.bf16 %v3452_v23  ;;  %v3453_v9 = vunpack.i.l.bf16 %v3452_v23  ;;  %v2977_v13 = vpack.c.bf16 %v1934_v56, %v1933_v6  ;;  %v2980_v33 = vpack.c.bf16 %v1922_v43, %v1921_v48 }
 0x6a1   : > { %2944 = vmatpush1.bf16.msra.mxu0 %v4663_v58 }
 0x6a2   : > { %v3447_v11 = vpop.permute.xlu1 %3446  ;;  %2947 = vmatprep.subr.msk.bf16.mxu0 %vm3958_vm13, %v2945_v21  ;;  %2976 = vmatpush1.bf16.msra.mxu1 %v4665_v8  ;;  %v1931_v10 = vsel %vm481_vm9, %v3443_v4, %v3453_v9  ;;  %v1932_v58 = vsel %vm481_vm9, %v3444_v41, %v3454_v7 }
 0x6a3   : > { %v3449_v5 = vunpack.i.h.bf16 %v3447_v11  ;;  %v3448_v25 = vunpack.i.l.bf16 %v3447_v11  ;;  %v3457_v42 = vpop.permute.xlu0 %3456  ;;  %2979 = vmatprep.subr.msk.bf16.mxu1 %vm3978_vm15, %v2977_v13  ;;  %v2954_v47 = vpack.c.bf16 %v1932_v58, %v1931_v10 }
 0x6a4   : > { %v3459_v49 = vunpack.i.h.bf16 %v3457_v42  ;;  %v3458_v26 = vunpack.i.l.bf16 %v3457_v42 }
 0x6a5   : > { %v1928_v46 = vsel %vm481_vm9, %v3454_v7, %v3449_v5  ;;  %v1927_v8 = vsel %vm481_vm9, %v3453_v9, %v3448_v25  ;;  %2950 = vmatpush1.bf16.msk.msra.mxu0 %vm3985_vm1, %v2948_v20 }
 0x6a6   : > { %v2951_v51 = vpack.c.bf16 %v1928_v46, %v1927_v8  ;;  %v1923_v27 = vsel %vm481_vm9, %v3448_v25, %v3458_v26  ;;  %v1924_v28 = vsel %vm481_vm9, %v3449_v5, %v3459_v49  ;;  %v1935_v45 = vsel %vm481_vm9, %v3458_v26, %v3443_v4  ;;  %2982 = vmatpush1.bf16.msk.msra.mxu1 %vm3999_vm2, %v2980_v33 }
 0x6a7   : > { %v1936_v31 = vsel %vm481_vm9, %v3459_v49, %v3444_v41  ;;  %v2986_v60 = vpack.c.bf16 %v1924_v28, %v1923_v27 }
 0x6a8   : > { %v2983_v53 = vpack.c.bf16 %v1936_v31, %v1935_v45  ;;  %2953 = vmatprep.subr.msk.bf16.mxu0 %vm3958_vm13, %v2951_v51 }
 0x6a9   : > { %2956 = vmatpush1.bf16.msk.msra.mxu0 %vm3985_vm1, %v2954_v47 }
 0x6aa   : > { %2985 = vmatprep.subr.msk.bf16.mxu1 %vm3978_vm15, %v2983_v53 }
 0x6ab   : > { %2988 = vmatpush1.bf16.msk.msra.mxu1 %vm3999_vm2, %v2986_v60 }
 0x6ac   : > { %2636 = vmatmul.mubr.msk.f32.vlgmr.msra.gmra.mrb[32].mxu0 %vm534_vm3, %v2612_v39 }
 0x6ad   : > { %2055 = vmatprep.mubr.f32.mxu0 %v3564_v32 }
 0x6ae   : > { %2656 = vmatmul.mubr.msk.f32.vlgmr.msra.gmra.mrb[32].mxu1 %vm534_vm3, %v2612_v39  ;;  %v2179_v39 = vld [vmem:[%s4887_s5] sm:$0x7] }
 0x6af   : > { %2144 = vmatprep.mubr.f32.mxu1 %v3564_v32 }
 0x6b0   : > { %2637 = vmatmul.mubr.msk.f32.gmra.mrb[34].mxu0 %vm534_vm3, %v2613_v0 }
 0x6b1   : > { %2061 = vmatprep.mubr.f32.mxu0 %v3564_v32 }
 0x6b2   : > { %2657 = vmatmul.mubr.msk.f32.gmra.mrb[34].mxu1 %vm534_vm3, %v2613_v0 }
 0x6b3   : > { %2150 = vmatprep.mubr.f32.mxu1 %v3564_v32  ;;  %v1956_v38 = vpop.permute.xlu1 %1955 }
 0x6b4   : > { %2638 = vmatmul.mubr.msk.f32.gmra.mrb[36].mxu0 %vm534_vm3, %v2614_v18  ;;  %v1961_v30 = vpop.permute.xlu0 %1960 }
 0x6b5   : > { %2067 = vmatprep.mubr.f32.mxu0 %v3564_v32 }
 0x6b6   : > { %2658 = vmatmul.mubr.msk.f32.gmra.mrb[36].mxu1 %vm534_vm3, %v2614_v18 }
 0x6b7   : > { %2156 = vmatprep.mubr.f32.mxu1 %v3564_v32  ;;  %v1966_v23 = vpop.permute.xlu1 %1965 }
 0x6b8   : > { %2639 = vmatmul.mubr.msk.f32.gmra.mrb[38].mxu0 %vm534_vm3, %v2615_v44  ;;  %v1971_v4 = vpop.permute.xlu0 %1970 }
 0x6b9   : > { %2254 = vmatprep.mubr.f32.mxu0 %v3564_v32 }
 0x6ba   : > { %2659 = vmatmul.mubr.msk.f32.gmra.mrb[38].mxu1 %vm534_vm3, %v2615_v44 }
 0x6bb   : > { %2325 = vmatprep.mubr.f32.mxu1 %v3564_v32  ;;  %v2184_v0 = vpop.permute.xlu1 %2183 }
 0x77f   : > { %v2051_v52 = vpop.f32.mrb[32].mxu0 }
 0x780   : > { %v2053_v2 = vpop.f32.mrb[33].mxu0  ;;  %v2052_v19 = vadd.f32 %v2051_v52, %v1956_v38 }
 0x781   : > { %v2140_v22 = vpop.f32.mrb[32].mxu1  ;;  %v2054_v34 = vadd.f32 %v2053_v2, %v1956_v38 }
 0x782   : > { %v2142_v40 = vpop.f32.mrb[33].mxu1  ;;  %v2141_v17 = vadd.f32 %v2140_v22, %v1956_v38  ;;  %v2163_v54 = vmax.f32 %v2052_v19, 0.0 }
 0x783   : > { %v2057_v24 = vpop.f32.mrb[34].mxu0  ;;  %v2143_v14 = vadd.f32 %v2142_v40, %v1956_v38  ;;  %v2164_v35 = vmax.f32 %v2054_v34, 0.0 }
 0x784   : > { %v2058_v55 = vadd.f32 %v2057_v24, %v1961_v30  ;;  %v2059_v15 = vpop.f32.mrb[35].mxu0  ;;  %v2165_v1 = vmax.f32 %v2141_v17, 0.0 }
 0x785   : > { %v2146_v16 = vpop.f32.mrb[34].mxu1  ;;  %v2060_v57 = vadd.f32 %v2059_v15, %v1961_v30  ;;  %v2166_v61 = vmax.f32 %v2143_v14, 0.0 }
 0x786   : > { %v2147_v3 = vadd.f32 %v2146_v16, %v1961_v30  ;;  %v2148_v29 = vpop.f32.mrb[35].mxu1  ;;  %v2167_v59 = vmax.f32 %v2058_v55, 0.0 }
 0x787   : > { %v2149_v32 = vadd.f32 %v2148_v29, %v1961_v30  ;;  %v2168_v62 = vmax.f32 %v2060_v57, 0.0  ;;  %v2063_v36 = vpop.f32.mrb[36].mxu0 }
 0x788   : > { %v2169_v63 = vmax.f32 %v2147_v3, 0.0  ;;  %v2991_v50 = vpack.c.bf16 %v2167_v59, %v2163_v54  ;;  %v2065_v6 = vpop.f32.mrb[37].mxu0  ;;  %v2064_v41 = vadd.f32 %v2063_v36, %v1966_v23 }
 0x789   : > { %v2170_v37 = vmax.f32 %v2149_v32, 0.0  ;;  %v2152_v56 = vpop.f32.mrb[36].mxu1  ;;  %v2989_v12 = vpack.c.bf16 %v2168_v62, %v2164_v35  ;;  %v2066_v7 = vadd.f32 %v2065_v6, %v1966_v23 }
 0x78a   : > { %v2999_v21 = vpack.c.bf16 %v2169_v63, %v2165_v1  ;;  %v2154_v48 = vpop.f32.mrb[37].mxu1  ;;  %v2153_v9 = vadd.f32 %v2152_v56, %v1966_v23  ;;  %v2171_v26 = vmax.f32 %v2064_v41, 0.0 }
 0x78b   : > { %v2997_v43 = vpack.c.bf16 %v2170_v37, %v2166_v61  ;;  %v2069_v13 = vpop.f32.mrb[38].mxu0  ;;  %2990 = vmatprep.subr.bf16.mxu0 %v2989_v12  ;;  %v2155_v11 = vadd.f32 %v2154_v48, %v1966_v23  ;;  %v2172_v46 = vmax.f32 %v2066_v7, 0.0 }
 0x78c   : > { %v2070_v5 = vadd.f32 %v2069_v13, %v1971_v4  ;;  %v2071_v25 = vpop.f32.mrb[39].mxu0  ;;  %2992 = vmatpush1.bf16.msra.mxu0 %v2991_v50  ;;  %v2173_v8 = vmax.f32 %v2153_v9, 0.0 }
 0x78d   : > { %v2158_v42 = vpop.f32.mrb[38].mxu1  ;;  %2998 = vmatprep.subr.bf16.mxu1 %v2997_v43  ;;  %v2072_v20 = vadd.f32 %v2071_v25, %v1971_v4  ;;  %v2174_v28 = vmax.f32 %v2155_v11, 0.0 }
 0x78e   : > { %v2159_v33 = vadd.f32 %v2158_v42, %v1971_v4  ;;  %v2160_v49 = vpop.f32.mrb[39].mxu1  ;;  %3000 = vmatpush1.bf16.msra.mxu1 %v2999_v21  ;;  %v2175_v10 = vmax.f32 %v2070_v5, 0.0 }
 0x78f   : > { %v2161_v58 = vadd.f32 %v2160_v49, %v1971_v4  ;;  %v2176_v51 = vmax.f32 %v2072_v20, 0.0 }
 0x790   : > { %v2177_v27 = vmax.f32 %v2159_v33, 0.0  ;;  %v2995_v45 = vpack.c.bf16 %v2175_v10, %v2171_v26 }
 0x791   : > { %v2178_v31 = vmax.f32 %v2161_v58, 0.0  ;;  %v2993_v60 = vpack.c.bf16 %v2176_v51, %v2172_v46 }
 0x792   : > { %v3003_v47 = vpack.c.bf16 %v2177_v27, %v2173_v8 }
 0x793   : > { %v3001_v53 = vpack.c.bf16 %v2178_v31, %v2174_v28  ;;  %2994 = vmatprep.subr.bf16.mxu0 %v2993_v60 }
 0x794   : > { %2996 = vmatpush1.bf16.msra.mxu0 %v2995_v45 }
 0x795   : > { %3002 = vmatprep.subr.bf16.mxu1 %v3001_v53 }
 0x796   : > { %3004 = vmatpush1.bf16.msra.mxu1 %v3003_v47 }
 0x797   : > { %2660 = vmatmul.mubr.msk.f32.vlgmr.msra.gmra.mrb[40].mxu0 %vm2186_vm0, %v2179_v39 }
 0x799   : > { %2661 = vmatmul.mubr.msk.f32.vlgmr.msra.gmra.mrb[40].mxu1 %vm2186_vm0, %v2179_v39 }
 0x86a   : > { %v2256_v18 = vpop.f32.mrb[40].mxu0 }
 0x86b   : > { %v2257_v44 = vadd.f32 %v2256_v18, %v2184_v0  ;;  %v2258_v52 = vpop.f32.mrb[41].mxu0 }
 0x86c   : > { %v2327_v2 = vpop.f32.mrb[40].mxu1  ;;  %v2259_v22 = vadd.f32 %v2258_v52, %v2184_v0 }
 0x86d   : > { %v2328_v38 = vadd.f32 %v2327_v2, %v2184_v0  ;;  %v2329_v40 = vpop.f32.mrb[41].mxu1 }
 0x86e   : > { %v2330_v19 = vadd.f32 %v2329_v40, %v2184_v0  ;;  %v2336_v30 = vcombine.low %v2257_v44, %v2259_v22 }
 0x870   : > { %v2337_v34 = vcombine.low %v2328_v38, %v2330_v19  ;;  %2340 = vst [vmem:[%s296_s8] sm:$0x77] %v2336_v30 }
 0x872   : > { %2341 = vst [vmem:[%s296_s8 + $0x8] sm:$0x77] %v2337_v34 }
 0x873   : > { %3503 = shalt.err (!%p3500_p3)
}
 0x874   : > { %s3504_s17 = scalar_lea.hbm %s4838_s15, 256  ;;  %s3508_s9 = scalar_lea.hbm %s4889_s7, 512 }
 0x875   : > { %p3505_p5 = scmp.ne.s32.totalorder %s4838_s15, %s3504_s17  ;;  %p3509_p9 = scmp.lt.u32.totalorder %s4838_s15, %s4889_s7 }
 0x876   : > { %p3510_p0 = scmp.lt.u32.totalorder %s3508_s9, %s3504_s17  ;;  %p3512_p6 = scmp.lt.u32.totalorder %s3504_s17, %s4838_s15 }
 0x877   : > { %p3506_p7 = pnand %p3505_p5, %p4921_p11 }
 0x878   : > { %p3511_p2 = por %p3510_p0, %p3509_p9 }
 0x879   : > { %p3507_p8 = pneg %p3506_p7 }
 0x87a   : > { %p3513_p12 = por %p3512_p6, %p3511_p2 }
 0x87c   : > { %p3514_p13 = pnand %p3513_p12, %p3507_p8 }
 0x87e   : > { %3517 = shalt.err (!%p3514_p13)
}
 0x87f   : > { %3007 = dma.vmem_to_hbm [thread:$0]  (%p4921_p11), %s4840_s11, 256, %s4838_s15, %s2343_s19  }
 0x880 PF: > { %s2369_s16 = sand.u32 1, %s3544_s24   ;;  %p4922_p4 = scmp.ne.s32.totalorder %s4894_s14, 0 }
 0x881   : > { %p4923_p10 = scmp.ge.s32.totalorder %s3556_s27, 2  ;;  %s2370_s18 = scalar_lea.sflag [#allocation4], %s2369_s16 }
 0x883   : > { %p3014_p1 = pnand %p4923_p10, %p4922_p4 }
 0x885   : > { %3539 = dma.done.wait (!%p3014_p1), %s2370_s18, 256  }
 0x886   : > { %3541 = vsyncadd (!%p3014_p1), %s2370_s18, 4294967040  ;;  %p20_p3 = scmp.ge.s32.totalorder %s3632_s30, 4   ;;  %s4924_s24 = smov %s3548_s25 }
 0x887   : > { %s4925_s25 = smov %s3552_s26  ;;  %s4926_s26 = smov %s3644_s10 }
 0x888   : > { %s4927_s27 = smov %s3632_s30  ;;  %22 = sbr.rel (!%p20_p3) target bundleno = 5 (0x5), region = 99 }
 0x88f   :  { %2375 = vsyncpa [#allocation3], 1 }
 0x890   :  { %2377 = vsyncpa [#allocation3 + $0x1], 1 }
 0x891   :  { %2378 = vsyncpa [#allocation4], 1 }
 0x892   :  { %2380 = vsyncpa [#allocation4 + $0x1], 1 }

</bundles_post_ra>
